<compile_context>
chip_gen: v5e
topology: v5e:2x2
jax: 0.10.0
libtpu: 0.0.40
codegen_flags: <defaults>
</compile_context>

<pallas_src>
import jax
import jax.numpy as jnp
from jax.experimental import pallas as pl
from jax.experimental.pallas import tpu as pltpu


# ----------------------------------------------------------------------------
# Fused LeNet5 kernel
# ----------------------------------------------------------------------------
def _lenet5_kernel(x_ref, wt1_ref, b1_ref, wt2_ref, b2_ref,
                   wfc1_ref, bfc1_ref, wfc2_ref, bfc2_ref, wfc3_ref, bfc3_ref,
                   out_ref, pool1_ref, flat_ref):
    f32 = jnp.float32
    TB = x_ref.shape[0]

    # ---------------- conv1 (1->6, 5x5) + ReLU + 2x2 max-pool ----------------
    # Banded matmul per kernel row; RHS lanes = [even out-cols | odd out-cols],
    # each block laid out as x_pooled*6 + out_channel.
    acc1 = None
    for kh in range(5):
        band = x_ref[:, kh:kh + 24, :].reshape(TB * 24, 28)          # (TB*24, 28)
        t = jnp.dot(band, wt1_ref[kh], preferred_element_type=f32)   # (TB*24, 144)
        acc1 = t if acc1 is None else acc1 + t
    h1 = jnp.maximum(acc1[:, :72], acc1[:, 72:])                     # width pool
    h1 = jnp.maximum(h1 + b1_ref[...], 0.0)                          # bias + ReLU
    h1 = h1.reshape(TB, 24, 72)
    for j in range(12):                                              # height pool
        pool1_ref[:, j, :] = jnp.maximum(h1[:, 2 * j, :], h1[:, 2 * j + 1, :])

    # ---------------- conv2 (6->16, 5x5) + ReLU + 2x2 max-pool ---------------
    acc2 = None
    for kh in range(5):
        band = pool1_ref[:, kh:kh + 8, :].reshape(TB * 8, 72)        # (TB*8, 72)
        t = jnp.dot(band, wt2_ref[kh], preferred_element_type=f32)   # (TB*8, 128)
        acc2 = t if acc2 is None else acc2 + t
    h2 = jnp.maximum(acc2[:, :64], acc2[:, 64:])                     # width pool
    h2 = jnp.maximum(h2 + b2_ref[...], 0.0)                          # bias + ReLU
    h2 = h2.reshape(TB, 8, 64)
    for j in range(4):                                               # height pool -> flatten
        flat_ref[:, 64 * j:64 * (j + 1)] = jnp.maximum(h2[:, 2 * j, :],
                                                       h2[:, 2 * j + 1, :])

    # --------------------- classifier: fc1 -> fc2 -> fc3 ---------------------
    h = jnp.dot(flat_ref[...], wfc1_ref[...], preferred_element_type=f32)
    h = jnp.maximum(h + bfc1_ref[...], 0.0)
    h = jnp.dot(h, wfc2_ref[...], preferred_element_type=f32)
    h = jnp.maximum(h + bfc2_ref[...], 0.0)
    h = jnp.dot(h, wfc3_ref[...], preferred_element_type=f32)
    out_ref[...] = jnp.maximum(h + bfc3_ref[...], 0.0)               # (TB, 10)


# ----------------------------------------------------------------------------
# One-time weight layout preparation (outside the per-step forward)
# ----------------------------------------------------------------------------
def prepare_params(params):
    f32 = jnp.float32

    # conv1: (6,1,5,5) -> banded (5, 28, 144).  Lane = [even|odd] blocks of
    # (pooled_col * 6 + oc).  wt1[kh, w_in, lane(xo,oc)] = w[oc,0,kh,w_in-xo].
    w1 = jnp.transpose(params["conv1_w"][:, 0], (1, 2, 0))           # (kh, kw, oc)
    w_in = jnp.arange(28)[:, None]
    xo = jnp.arange(24)[None, :]
    kw = w_in - xo
    valid = ((kw >= 0) & (kw <= 4)).astype(f32)                      # (28, 24)
    wt1 = w1[:, jnp.clip(kw, 0, 4), :] * valid[None, :, :, None]     # (5,28,24,6)
    wt1 = jnp.concatenate([wt1[:, :, 0::2, :].reshape(5, 28, 72),
                           wt1[:, :, 1::2, :].reshape(5, 28, 72)], axis=-1)

    # conv2: (16,6,5,5) -> banded (5, 72, 128).  Input lane = x_in*6 + ic,
    # output lane = [even|odd] blocks of (pooled_col*16 + oc).
    w2 = jnp.transpose(params["conv2_w"], (2, 1, 3, 0))              # (kh, ic, kw, oc)
    xi = jnp.arange(12)[:, None]
    xo2 = jnp.arange(8)[None, :]
    kw2 = xi - xo2
    valid2 = ((kw2 >= 0) & (kw2 <= 4)).astype(f32)                   # (12, 8)
    t = w2[:, :, jnp.clip(kw2, 0, 4), :] * valid2[None, None, :, :, None]  # (5,6,12,8,16)
    t = jnp.transpose(t, (0, 2, 1, 3, 4)).reshape(5, 72, 8, 16)      # (kh, xi*6+ic, xo, oc)
    wt2 = jnp.concatenate([t[:, :, 0::2, :].reshape(5, 72, 64),
                           t[:, :, 1::2, :].reshape(5, 72, 64)], axis=-1)

    # fc1: torch flatten order is (c, h, w); kernel flat buffer is (h, w, c).
    wfc1 = jnp.transpose(params["fc1_w"].reshape(120, 16, 4, 4),
                         (2, 3, 1, 0)).reshape(256, 120)

    return {
        "wt1": wt1, "b1": jnp.tile(params["conv1_b"], 12).reshape(1, 72),
        "wt2": wt2, "b2": jnp.tile(params["conv2_b"], 4).reshape(1, 64),
        "wfc1": wfc1, "bfc1": params["fc1_b"].reshape(1, 120),
        "wfc2": params["fc2_w"].T, "bfc2": params["fc2_b"].reshape(1, 84),
        "wfc3": params["fc3_w"].T, "bfc3": params["fc3_b"].reshape(1, 10),
    }


# ----------------------------------------------------------------------------
# Forward wrapper
# ----------------------------------------------------------------------------
@jax.jit
def lenet5_forward(prep, x):
    B = x.shape[0]
    xs = x[:, 0].astype(jnp.float32)                                  # (B, 28, 28)

    # Batch tile: grid over batch (parallel -> shards across TensorCores on
    # v7x) while keeping per-step VMEM bounded.
    TB = B if (B <= 32 or B % 32 != 0) else 32
    grid = (B // TB,)

    def _const(arr):
        nd = arr.ndim
        return pl.BlockSpec(arr.shape, lambda i, _nd=nd: (0,) * _nd)

    weights = (prep["wt1"], prep["b1"], prep["wt2"], prep["b2"],
               prep["wfc1"], prep["bfc1"], prep["wfc2"], prep["bfc2"],
               prep["wfc3"], prep["bfc3"])

    return pl.pallas_call(
        _lenet5_kernel,
        out_shape=jax.ShapeDtypeStruct((B, 10), jnp.float32),
        grid=grid,
        in_specs=[pl.BlockSpec((TB, 28, 28), lambda i: (i, 0, 0))]
                 + [_const(w) for w in weights],
        out_specs=pl.BlockSpec((TB, 10), lambda i: (i, 0)),
        scratch_shapes=[pltpu.VMEM((TB, 12, 72), jnp.float32),   # pooled conv1
                        pltpu.VMEM((TB, 256), jnp.float32)],     # flattened conv2
        compiler_params=pltpu.CompilerParams(
            dimension_semantics=("parallel",)),
    )(xs, *weights)


# ----------------------------------------------------------------------------
# Parameters + pure-JAX reference (correctness check)
# ----------------------------------------------------------------------------
def init_params(key):
    ks = jax.random.split(key, 10)
    s = 0.1
    return {
        "conv1_w": s * jax.random.normal(ks[0], (6, 1, 5, 5), jnp.float32),
        "conv1_b": s * jax.random.normal(ks[1], (6,), jnp.float32),
        "conv2_w": s * jax.random.normal(ks[2], (16, 6, 5, 5), jnp.float32),
        "conv2_b": s * jax.random.normal(ks[3], (16,), jnp.float32),
        "fc1_w": s * jax.random.normal(ks[4], (120, 256), jnp.float32),
        "fc1_b": s * jax.random.normal(ks[5], (120,), jnp.float32),
        "fc2_w": s * jax.random.normal(ks[6], (84, 120), jnp.float32),
        "fc2_b": s * jax.random.normal(ks[7], (84,), jnp.float32),
        "fc3_w": s * jax.random.normal(ks[8], (10, 84), jnp.float32),
        "fc3_b": s * jax.random.normal(ks[9], (10,), jnp.float32),
    }


def lenet5_reference(params, x):
    def conv(x, w, b):
        y = jax.lax.conv_general_dilated(
            x, w, (1, 1), "VALID", dimension_numbers=("NCHW", "OIHW", "NCHW"))
        return y + b[None, :, None, None]

    def pool(x):
        return jax.lax.reduce_window(
            x, -jnp.inf, jax.lax.max, (1, 1, 2, 2), (1, 1, 2, 2), "VALID")

    y = pool(jax.nn.relu(conv(x, params["conv1_w"], params["conv1_b"])))
    y = pool(jax.nn.relu(conv(y, params["conv2_w"], params["conv2_b"])))
    y = y.reshape(y.shape[0], -1)
    y = jax.nn.relu(y @ params["fc1_w"].T + params["fc1_b"])
    y = jax.nn.relu(y @ params["fc2_w"].T + params["fc2_b"])
    y = jax.nn.relu(y @ params["fc3_w"].T + params["fc3_b"])
    return y


if __name__ == "__main__":
    key = jax.random.PRNGKey(0)
    pkey, xkey = jax.random.split(key)
    params = init_params(pkey)
    prep = prepare_params(params)

    x = jax.random.normal(xkey, (2, 1, 28, 28), jnp.float32)   # MNIST-shaped, B=2
    out = jax.block_until_ready(lenet5_forward(prep, x))
    assert out.shape == (2, 10)

    ref = lenet5_reference(params, x)
    if not jnp.allclose(out, ref, atol=2e-3, rtol=2e-3):
        raise SystemExit("numerical mismatch vs pure-JAX reference")
    print("KERNEL_OK")
</pallas_src>

<mosaic_0001>
module attributes {stable_mosaic.version = 11 : i64} {
  func.func @_lenet5_kernel(%arg0: i32, %arg1: memref<2x28x28xf32, #tpu.memory_space<vmem>>, %arg2: memref<5x28x144xf32, #tpu.memory_space<vmem>>, %arg3: memref<1x72xf32, #tpu.memory_space<vmem>>, %arg4: memref<5x72x128xf32, #tpu.memory_space<vmem>>, %arg5: memref<1x64xf32, #tpu.memory_space<vmem>>, %arg6: memref<256x120xf32, #tpu.memory_space<vmem>>, %arg7: memref<1x120xf32, #tpu.memory_space<vmem>>, %arg8: memref<120x84xf32, #tpu.memory_space<vmem>>, %arg9: memref<1x84xf32, #tpu.memory_space<vmem>>, %arg10: memref<84x10xf32, #tpu.memory_space<vmem>>, %arg11: memref<1x10xf32, #tpu.memory_space<vmem>>, %arg12: memref<2x10xf32, #tpu.memory_space<vmem>>, %arg13: memref<2x12x72xf32, #tpu.memory_space<vmem>>, %arg14: memref<2x256xf32, #tpu.memory_space<vmem>>) attributes {dimension_semantics = [#tpu.dimension_semantics<parallel>], iteration_bounds = array<i64: 1>, scalar_prefetch = 0 : i64, scratch_operands = 2 : i64, tpu.core_type = #tpu.core_type<tc>, window_params = [{transform_indices = @transform_0, window_bounds = array<i64: 2, 28, 28>}, {pipeline_mode = #tpu.pipeline_mode<synchronous>, transform_indices = @transform_1, window_bounds = array<i64: 5, 28, 144>}, {pipeline_mode = #tpu.pipeline_mode<synchronous>, transform_indices = @transform_2, window_bounds = array<i64: 1, 72>}, {pipeline_mode = #tpu.pipeline_mode<synchronous>, transform_indices = @transform_3, window_bounds = array<i64: 5, 72, 128>}, {pipeline_mode = #tpu.pipeline_mode<synchronous>, transform_indices = @transform_4, window_bounds = array<i64: 1, 64>}, {pipeline_mode = #tpu.pipeline_mode<synchronous>, transform_indices = @transform_5, window_bounds = array<i64: 256, 120>}, {pipeline_mode = #tpu.pipeline_mode<synchronous>, transform_indices = @transform_6, window_bounds = array<i64: 1, 120>}, {pipeline_mode = #tpu.pipeline_mode<synchronous>, transform_indices = @transform_7, window_bounds = array<i64: 120, 84>}, {pipeline_mode = #tpu.pipeline_mode<synchronous>, transform_indices = @transform_8, window_bounds = array<i64: 1, 84>}, {pipeline_mode = #tpu.pipeline_mode<synchronous>, transform_indices = @transform_9, window_bounds = array<i64: 84, 10>}, {pipeline_mode = #tpu.pipeline_mode<synchronous>, transform_indices = @transform_10, window_bounds = array<i64: 1, 10>}, {transform_indices = @transform_11, window_bounds = array<i64: 2, 10>}]} {
    %c0 = arith.constant 0 : index
    %c0_0 = arith.constant 0 : index
    %c0_1 = arith.constant 0 : index
    %0 = vector.load %arg1[%c0, %c0_0, %c0_1] : memref<2x28x28xf32, #tpu.memory_space<vmem>>, vector<2x24x28xf32>
    %1 = vector.shape_cast %0 : vector<2x24x28xf32> to vector<48x28xf32>
    %c0_2 = arith.constant 0 : index
    %c0_3 = arith.constant 0 : index
    %c0_4 = arith.constant 0 : index
    %2 = vector.load %arg2[%c0_2, %c0_3, %c0_4] : memref<5x28x144xf32, #tpu.memory_space<vmem>>, vector<1x28x144xf32>
    %3 = vector.shape_cast %2 : vector<1x28x144xf32> to vector<28x144xf32>
    %cst = arith.constant dense<0.000000e+00> : vector<48x144xf32>
    %4 = tpu.matmul %1, %3, %cst {dimension_numbers = #tpu.dot_dimension_numbers<[1], [0], [0], [1], [0, 0, 1, 1], [], []>} : vector<48x28xf32>, vector<28x144xf32>, vector<48x144xf32> -> vector<48x144xf32>
    %c0_5 = arith.constant 0 : index
    %c1 = arith.constant 1 : index
    %c0_6 = arith.constant 0 : index
    %5 = vector.load %arg1[%c0_5, %c1, %c0_6] : memref<2x28x28xf32, #tpu.memory_space<vmem>>, vector<2x24x28xf32>
    %6 = vector.shape_cast %5 : vector<2x24x28xf32> to vector<48x28xf32>
    %c1_7 = arith.constant 1 : index
    %c0_8 = arith.constant 0 : index
    %c0_9 = arith.constant 0 : index
    %7 = vector.load %arg2[%c1_7, %c0_8, %c0_9] : memref<5x28x144xf32, #tpu.memory_space<vmem>>, vector<1x28x144xf32>
    %8 = vector.shape_cast %7 : vector<1x28x144xf32> to vector<28x144xf32>
    %cst_10 = arith.constant dense<0.000000e+00> : vector<48x144xf32>
    %9 = tpu.matmul %6, %8, %cst_10 {dimension_numbers = #tpu.dot_dimension_numbers<[1], [0], [0], [1], [0, 0, 1, 1], [], []>} : vector<48x28xf32>, vector<28x144xf32>, vector<48x144xf32> -> vector<48x144xf32>
    %10 = arith.addf %4, %9 : vector<48x144xf32>
    %c0_11 = arith.constant 0 : index
    %c2 = arith.constant 2 : index
    %c0_12 = arith.constant 0 : index
    %11 = vector.load %arg1[%c0_11, %c2, %c0_12] : memref<2x28x28xf32, #tpu.memory_space<vmem>>, vector<2x24x28xf32>
    %12 = vector.shape_cast %11 : vector<2x24x28xf32> to vector<48x28xf32>
    %c2_13 = arith.constant 2 : index
    %c0_14 = arith.constant 0 : index
    %c0_15 = arith.constant 0 : index
    %13 = vector.load %arg2[%c2_13, %c0_14, %c0_15] : memref<5x28x144xf32, #tpu.memory_space<vmem>>, vector<1x28x144xf32>
    %14 = vector.shape_cast %13 : vector<1x28x144xf32> to vector<28x144xf32>
    %cst_16 = arith.constant dense<0.000000e+00> : vector<48x144xf32>
    %15 = tpu.matmul %12, %14, %cst_16 {dimension_numbers = #tpu.dot_dimension_numbers<[1], [0], [0], [1], [0, 0, 1, 1], [], []>} : vector<48x28xf32>, vector<28x144xf32>, vector<48x144xf32> -> vector<48x144xf32>
    %16 = arith.addf %10, %15 : vector<48x144xf32>
    %c0_17 = arith.constant 0 : index
    %c3 = arith.constant 3 : index
    %c0_18 = arith.constant 0 : index
    %17 = vector.load %arg1[%c0_17, %c3, %c0_18] : memref<2x28x28xf32, #tpu.memory_space<vmem>>, vector<2x24x28xf32>
    %18 = vector.shape_cast %17 : vector<2x24x28xf32> to vector<48x28xf32>
    %c3_19 = arith.constant 3 : index
    %c0_20 = arith.constant 0 : index
    %c0_21 = arith.constant 0 : index
    %19 = vector.load %arg2[%c3_19, %c0_20, %c0_21] : memref<5x28x144xf32, #tpu.memory_space<vmem>>, vector<1x28x144xf32>
    %20 = vector.shape_cast %19 : vector<1x28x144xf32> to vector<28x144xf32>
    %cst_22 = arith.constant dense<0.000000e+00> : vector<48x144xf32>
    %21 = tpu.matmul %18, %20, %cst_22 {dimension_numbers = #tpu.dot_dimension_numbers<[1], [0], [0], [1], [0, 0, 1, 1], [], []>} : vector<48x28xf32>, vector<28x144xf32>, vector<48x144xf32> -> vector<48x144xf32>
    %22 = arith.addf %16, %21 : vector<48x144xf32>
    %c0_23 = arith.constant 0 : index
    %c4 = arith.constant 4 : index
    %c0_24 = arith.constant 0 : index
    %23 = vector.load %arg1[%c0_23, %c4, %c0_24] : memref<2x28x28xf32, #tpu.memory_space<vmem>>, vector<2x24x28xf32>
    %24 = vector.shape_cast %23 : vector<2x24x28xf32> to vector<48x28xf32>
    %c4_25 = arith.constant 4 : index
    %c0_26 = arith.constant 0 : index
    %c0_27 = arith.constant 0 : index
    %25 = vector.load %arg2[%c4_25, %c0_26, %c0_27] : memref<5x28x144xf32, #tpu.memory_space<vmem>>, vector<1x28x144xf32>
    %26 = vector.shape_cast %25 : vector<1x28x144xf32> to vector<28x144xf32>
    %cst_28 = arith.constant dense<0.000000e+00> : vector<48x144xf32>
    %27 = tpu.matmul %24, %26, %cst_28 {dimension_numbers = #tpu.dot_dimension_numbers<[1], [0], [0], [1], [0, 0, 1, 1], [], []>} : vector<48x28xf32>, vector<28x144xf32>, vector<48x144xf32> -> vector<48x144xf32>
    %28 = arith.addf %22, %27 : vector<48x144xf32>
    %29 = vector.extract_strided_slice %28 {offsets = [0, 0], sizes = [48, 72], strides = [1, 1]} : vector<48x144xf32> to vector<48x72xf32>
    %30 = vector.extract_strided_slice %28 {offsets = [0, 72], sizes = [48, 72], strides = [1, 1]} : vector<48x144xf32> to vector<48x72xf32>
    %31 = arith.maximumf %29, %30 : vector<48x72xf32>
    %c0_29 = arith.constant 0 : index
    %c0_30 = arith.constant 0 : index
    %32 = vector.load %arg3[%c0_29, %c0_30] : memref<1x72xf32, #tpu.memory_space<vmem>>, vector<1x72xf32>
    %33 = vector.broadcast %32 : vector<1x72xf32> to vector<48x72xf32>
    %34 = arith.addf %31, %33 : vector<48x72xf32>
    %cst_31 = arith.constant 0.000000e+00 : f32
    %35 = vector.broadcast %cst_31 : f32 to vector<48x72xf32>
    %36 = arith.maximumf %34, %35 : vector<48x72xf32>
    %37 = vector.shape_cast %36 : vector<48x72xf32> to vector<2x24x72xf32>
    %38 = vector.extract_strided_slice %37 {offsets = [0, 0, 0], sizes = [2, 1, 72], strides = [1, 1, 1]} : vector<2x24x72xf32> to vector<2x1x72xf32>
    %39 = vector.shape_cast %38 : vector<2x1x72xf32> to vector<2x72xf32>
    %40 = vector.extract_strided_slice %37 {offsets = [0, 1, 0], sizes = [2, 1, 72], strides = [1, 1, 1]} : vector<2x24x72xf32> to vector<2x1x72xf32>
    %41 = vector.shape_cast %40 : vector<2x1x72xf32> to vector<2x72xf32>
    %42 = arith.maximumf %39, %41 : vector<2x72xf32>
    %c0_32 = arith.constant 0 : index
    %c0_33 = arith.constant 0 : index
    %c0_34 = arith.constant 0 : index
    %43 = vector.load %arg13[%c0_32, %c0_33, %c0_34] : memref<2x12x72xf32, #tpu.memory_space<vmem>>, vector<2x1x72xf32>
    %44 = vector.shape_cast %43 : vector<2x1x72xf32> to vector<2x72xf32>
    %45 = vector.shape_cast %42 : vector<2x72xf32> to vector<2x1x72xf32>
    tpu.vector_store %arg13[%c0_32, %c0_33, %c0_34], %45 {strides = array<i32>} : memref<2x12x72xf32, #tpu.memory_space<vmem>>, vector<2x1x72xf32>,
    %46 = vector.extract_strided_slice %37 {offsets = [0, 2, 0], sizes = [2, 1, 72], strides = [1, 1, 1]} : vector<2x24x72xf32> to vector<2x1x72xf32>
    %47 = vector.shape_cast %46 : vector<2x1x72xf32> to vector<2x72xf32>
    %48 = vector.extract_strided_slice %37 {offsets = [0, 3, 0], sizes = [2, 1, 72], strides = [1, 1, 1]} : vector<2x24x72xf32> to vector<2x1x72xf32>
    %49 = vector.shape_cast %48 : vector<2x1x72xf32> to vector<2x72xf32>
    %50 = arith.maximumf %47, %49 : vector<2x72xf32>
    %c0_35 = arith.constant 0 : index
    %c1_36 = arith.constant 1 : index
    %c0_37 = arith.constant 0 : index
    %51 = vector.load %arg13[%c0_35, %c1_36, %c0_37] : memref<2x12x72xf32, #tpu.memory_space<vmem>>, vector<2x1x72xf32>
    %52 = vector.shape_cast %51 : vector<2x1x72xf32> to vector<2x72xf32>
    %53 = vector.shape_cast %50 : vector<2x72xf32> to vector<2x1x72xf32>
    tpu.vector_store %arg13[%c0_35, %c1_36, %c0_37], %53 {strides = array<i32>} : memref<2x12x72xf32, #tpu.memory_space<vmem>>, vector<2x1x72xf32>,
    %54 = vector.extract_strided_slice %37 {offsets = [0, 4, 0], sizes = [2, 1, 72], strides = [1, 1, 1]} : vector<2x24x72xf32> to vector<2x1x72xf32>
    %55 = vector.shape_cast %54 : vector<2x1x72xf32> to vector<2x72xf32>
    %56 = vector.extract_strided_slice %37 {offsets = [0, 5, 0], sizes = [2, 1, 72], strides = [1, 1, 1]} : vector<2x24x72xf32> to vector<2x1x72xf32>
    %57 = vector.shape_cast %56 : vector<2x1x72xf32> to vector<2x72xf32>
    %58 = arith.maximumf %55, %57 : vector<2x72xf32>
    %c0_38 = arith.constant 0 : index
    %c2_39 = arith.constant 2 : index
    %c0_40 = arith.constant 0 : index
    %59 = vector.load %arg13[%c0_38, %c2_39, %c0_40] : memref<2x12x72xf32, #tpu.memory_space<vmem>>, vector<2x1x72xf32>
    %60 = vector.shape_cast %59 : vector<2x1x72xf32> to vector<2x72xf32>
    %61 = vector.shape_cast %58 : vector<2x72xf32> to vector<2x1x72xf32>
    tpu.vector_store %arg13[%c0_38, %c2_39, %c0_40], %61 {strides = array<i32>} : memref<2x12x72xf32, #tpu.memory_space<vmem>>, vector<2x1x72xf32>,
    %62 = vector.extract_strided_slice %37 {offsets = [0, 6, 0], sizes = [2, 1, 72], strides = [1, 1, 1]} : vector<2x24x72xf32> to vector<2x1x72xf32>
    %63 = vector.shape_cast %62 : vector<2x1x72xf32> to vector<2x72xf32>
    %64 = vector.extract_strided_slice %37 {offsets = [0, 7, 0], sizes = [2, 1, 72], strides = [1, 1, 1]} : vector<2x24x72xf32> to vector<2x1x72xf32>
    %65 = vector.shape_cast %64 : vector<2x1x72xf32> to vector<2x72xf32>
    %66 = arith.maximumf %63, %65 : vector<2x72xf32>
    %c0_41 = arith.constant 0 : index
    %c3_42 = arith.constant 3 : index
    %c0_43 = arith.constant 0 : index
    %67 = vector.load %arg13[%c0_41, %c3_42, %c0_43] : memref<2x12x72xf32, #tpu.memory_space<vmem>>, vector<2x1x72xf32>
    %68 = vector.shape_cast %67 : vector<2x1x72xf32> to vector<2x72xf32>
    %69 = vector.shape_cast %66 : vector<2x72xf32> to vector<2x1x72xf32>
    tpu.vector_store %arg13[%c0_41, %c3_42, %c0_43], %69 {strides = array<i32>} : memref<2x12x72xf32, #tpu.memory_space<vmem>>, vector<2x1x72xf32>,
    %70 = vector.extract_strided_slice %37 {offsets = [0, 8, 0], sizes = [2, 1, 72], strides = [1, 1, 1]} : vector<2x24x72xf32> to vector<2x1x72xf32>
    %71 = vector.shape_cast %70 : vector<2x1x72xf32> to vector<2x72xf32>
    %72 = vector.extract_strided_slice %37 {offsets = [0, 9, 0], sizes = [2, 1, 72], strides = [1, 1, 1]} : vector<2x24x72xf32> to vector<2x1x72xf32>
    %73 = vector.shape_cast %72 : vector<2x1x72xf32> to vector<2x72xf32>
    %74 = arith.maximumf %71, %73 : vector<2x72xf32>
    %c0_44 = arith.constant 0 : index
    %c4_45 = arith.constant 4 : index
    %c0_46 = arith.constant 0 : index
    %75 = vector.load %arg13[%c0_44, %c4_45, %c0_46] : memref<2x12x72xf32, #tpu.memory_space<vmem>>, vector<2x1x72xf32>
    %76 = vector.shape_cast %75 : vector<2x1x72xf32> to vector<2x72xf32>
    %77 = vector.shape_cast %74 : vector<2x72xf32> to vector<2x1x72xf32>
    tpu.vector_store %arg13[%c0_44, %c4_45, %c0_46], %77 {strides = array<i32>} : memref<2x12x72xf32, #tpu.memory_space<vmem>>, vector<2x1x72xf32>,
    %78 = vector.extract_strided_slice %37 {offsets = [0, 10, 0], sizes = [2, 1, 72], strides = [1, 1, 1]} : vector<2x24x72xf32> to vector<2x1x72xf32>
    %79 = vector.shape_cast %78 : vector<2x1x72xf32> to vector<2x72xf32>
    %80 = vector.extract_strided_slice %37 {offsets = [0, 11, 0], sizes = [2, 1, 72], strides = [1, 1, 1]} : vector<2x24x72xf32> to vector<2x1x72xf32>
    %81 = vector.shape_cast %80 : vector<2x1x72xf32> to vector<2x72xf32>
    %82 = arith.maximumf %79, %81 : vector<2x72xf32>
    %c0_47 = arith.constant 0 : index
    %c5 = arith.constant 5 : index
    %c0_48 = arith.constant 0 : index
    %83 = vector.load %arg13[%c0_47, %c5, %c0_48] : memref<2x12x72xf32, #tpu.memory_space<vmem>>, vector<2x1x72xf32>
    %84 = vector.shape_cast %83 : vector<2x1x72xf32> to vector<2x72xf32>
    %85 = vector.shape_cast %82 : vector<2x72xf32> to vector<2x1x72xf32>
    tpu.vector_store %arg13[%c0_47, %c5, %c0_48], %85 {strides = array<i32>} : memref<2x12x72xf32, #tpu.memory_space<vmem>>, vector<2x1x72xf32>,
    %86 = vector.extract_strided_slice %37 {offsets = [0, 12, 0], sizes = [2, 1, 72], strides = [1, 1, 1]} : vector<2x24x72xf32> to vector<2x1x72xf32>
    %87 = vector.shape_cast %86 : vector<2x1x72xf32> to vector<2x72xf32>
    %88 = vector.extract_strided_slice %37 {offsets = [0, 13, 0], sizes = [2, 1, 72], strides = [1, 1, 1]} : vector<2x24x72xf32> to vector<2x1x72xf32>
    %89 = vector.shape_cast %88 : vector<2x1x72xf32> to vector<2x72xf32>
    %90 = arith.maximumf %87, %89 : vector<2x72xf32>
    %c0_49 = arith.constant 0 : index
    %c6 = arith.constant 6 : index
    %c0_50 = arith.constant 0 : index
    %91 = vector.load %arg13[%c0_49, %c6, %c0_50] : memref<2x12x72xf32, #tpu.memory_space<vmem>>, vector<2x1x72xf32>
    %92 = vector.shape_cast %91 : vector<2x1x72xf32> to vector<2x72xf32>
    %93 = vector.shape_cast %90 : vector<2x72xf32> to vector<2x1x72xf32>
    tpu.vector_store %arg13[%c0_49, %c6, %c0_50], %93 {strides = array<i32>} : memref<2x12x72xf32, #tpu.memory_space<vmem>>, vector<2x1x72xf32>,
    %94 = vector.extract_strided_slice %37 {offsets = [0, 14, 0], sizes = [2, 1, 72], strides = [1, 1, 1]} : vector<2x24x72xf32> to vector<2x1x72xf32>
    %95 = vector.shape_cast %94 : vector<2x1x72xf32> to vector<2x72xf32>
    %96 = vector.extract_strided_slice %37 {offsets = [0, 15, 0], sizes = [2, 1, 72], strides = [1, 1, 1]} : vector<2x24x72xf32> to vector<2x1x72xf32>
    %97 = vector.shape_cast %96 : vector<2x1x72xf32> to vector<2x72xf32>
    %98 = arith.maximumf %95, %97 : vector<2x72xf32>
    %c0_51 = arith.constant 0 : index
    %c7 = arith.constant 7 : index
    %c0_52 = arith.constant 0 : index
    %99 = vector.load %arg13[%c0_51, %c7, %c0_52] : memref<2x12x72xf32, #tpu.memory_space<vmem>>, vector<2x1x72xf32>
    %100 = vector.shape_cast %99 : vector<2x1x72xf32> to vector<2x72xf32>
    %101 = vector.shape_cast %98 : vector<2x72xf32> to vector<2x1x72xf32>
    tpu.vector_store %arg13[%c0_51, %c7, %c0_52], %101 {strides = array<i32>} : memref<2x12x72xf32, #tpu.memory_space<vmem>>, vector<2x1x72xf32>,
    %102 = vector.extract_strided_slice %37 {offsets = [0, 16, 0], sizes = [2, 1, 72], strides = [1, 1, 1]} : vector<2x24x72xf32> to vector<2x1x72xf32>
    %103 = vector.shape_cast %102 : vector<2x1x72xf32> to vector<2x72xf32>
    %104 = vector.extract_strided_slice %37 {offsets = [0, 17, 0], sizes = [2, 1, 72], strides = [1, 1, 1]} : vector<2x24x72xf32> to vector<2x1x72xf32>
    %105 = vector.shape_cast %104 : vector<2x1x72xf32> to vector<2x72xf32>
    %106 = arith.maximumf %103, %105 : vector<2x72xf32>
    %c0_53 = arith.constant 0 : index
    %c8 = arith.constant 8 : index
    %c0_54 = arith.constant 0 : index
    %107 = vector.load %arg13[%c0_53, %c8, %c0_54] : memref<2x12x72xf32, #tpu.memory_space<vmem>>, vector<2x1x72xf32>
    %108 = vector.shape_cast %107 : vector<2x1x72xf32> to vector<2x72xf32>
    %109 = vector.shape_cast %106 : vector<2x72xf32> to vector<2x1x72xf32>
    tpu.vector_store %arg13[%c0_53, %c8, %c0_54], %109 {strides = array<i32>} : memref<2x12x72xf32, #tpu.memory_space<vmem>>, vector<2x1x72xf32>,
    %110 = vector.extract_strided_slice %37 {offsets = [0, 18, 0], sizes = [2, 1, 72], strides = [1, 1, 1]} : vector<2x24x72xf32> to vector<2x1x72xf32>
    %111 = vector.shape_cast %110 : vector<2x1x72xf32> to vector<2x72xf32>
    %112 = vector.extract_strided_slice %37 {offsets = [0, 19, 0], sizes = [2, 1, 72], strides = [1, 1, 1]} : vector<2x24x72xf32> to vector<2x1x72xf32>
    %113 = vector.shape_cast %112 : vector<2x1x72xf32> to vector<2x72xf32>
    %114 = arith.maximumf %111, %113 : vector<2x72xf32>
    %c0_55 = arith.constant 0 : index
    %c9 = arith.constant 9 : index
    %c0_56 = arith.constant 0 : index
    %115 = vector.load %arg13[%c0_55, %c9, %c0_56] : memref<2x12x72xf32, #tpu.memory_space<vmem>>, vector<2x1x72xf32>
    %116 = vector.shape_cast %115 : vector<2x1x72xf32> to vector<2x72xf32>
    %117 = vector.shape_cast %114 : vector<2x72xf32> to vector<2x1x72xf32>
    tpu.vector_store %arg13[%c0_55, %c9, %c0_56], %117 {strides = array<i32>} : memref<2x12x72xf32, #tpu.memory_space<vmem>>, vector<2x1x72xf32>,
    %118 = vector.extract_strided_slice %37 {offsets = [0, 20, 0], sizes = [2, 1, 72], strides = [1, 1, 1]} : vector<2x24x72xf32> to vector<2x1x72xf32>
    %119 = vector.shape_cast %118 : vector<2x1x72xf32> to vector<2x72xf32>
    %120 = vector.extract_strided_slice %37 {offsets = [0, 21, 0], sizes = [2, 1, 72], strides = [1, 1, 1]} : vector<2x24x72xf32> to vector<2x1x72xf32>
    %121 = vector.shape_cast %120 : vector<2x1x72xf32> to vector<2x72xf32>
    %122 = arith.maximumf %119, %121 : vector<2x72xf32>
    %c0_57 = arith.constant 0 : index
    %c10 = arith.constant 10 : index
    %c0_58 = arith.constant 0 : index
    %123 = vector.load %arg13[%c0_57, %c10, %c0_58] : memref<2x12x72xf32, #tpu.memory_space<vmem>>, vector<2x1x72xf32>
    %124 = vector.shape_cast %123 : vector<2x1x72xf32> to vector<2x72xf32>
    %125 = vector.shape_cast %122 : vector<2x72xf32> to vector<2x1x72xf32>
    tpu.vector_store %arg13[%c0_57, %c10, %c0_58], %125 {strides = array<i32>} : memref<2x12x72xf32, #tpu.memory_space<vmem>>, vector<2x1x72xf32>,
    %126 = vector.extract_strided_slice %37 {offsets = [0, 22, 0], sizes = [2, 1, 72], strides = [1, 1, 1]} : vector<2x24x72xf32> to vector<2x1x72xf32>
    %127 = vector.shape_cast %126 : vector<2x1x72xf32> to vector<2x72xf32>
    %128 = vector.extract_strided_slice %37 {offsets = [0, 23, 0], sizes = [2, 1, 72], strides = [1, 1, 1]} : vector<2x24x72xf32> to vector<2x1x72xf32>
    %129 = vector.shape_cast %128 : vector<2x1x72xf32> to vector<2x72xf32>
    %130 = arith.maximumf %127, %129 : vector<2x72xf32>
    %c0_59 = arith.constant 0 : index
    %c11 = arith.constant 11 : index
    %c0_60 = arith.constant 0 : index
    %131 = vector.load %arg13[%c0_59, %c11, %c0_60] : memref<2x12x72xf32, #tpu.memory_space<vmem>>, vector<2x1x72xf32>
    %132 = vector.shape_cast %131 : vector<2x1x72xf32> to vector<2x72xf32>
    %133 = vector.shape_cast %130 : vector<2x72xf32> to vector<2x1x72xf32>
    tpu.vector_store %arg13[%c0_59, %c11, %c0_60], %133 {strides = array<i32>} : memref<2x12x72xf32, #tpu.memory_space<vmem>>, vector<2x1x72xf32>,
    %c0_61 = arith.constant 0 : index
    %c0_62 = arith.constant 0 : index
    %c0_63 = arith.constant 0 : index
    %134 = vector.load %arg13[%c0_61, %c0_62, %c0_63] : memref<2x12x72xf32, #tpu.memory_space<vmem>>, vector<2x8x72xf32>
    %135 = vector.shape_cast %134 : vector<2x8x72xf32> to vector<16x72xf32>
    %c0_64 = arith.constant 0 : index
    %c0_65 = arith.constant 0 : index
    %c0_66 = arith.constant 0 : index
    %136 = vector.load %arg4[%c0_64, %c0_65, %c0_66] : memref<5x72x128xf32, #tpu.memory_space<vmem>>, vector<1x72x128xf32>
    %137 = vector.shape_cast %136 : vector<1x72x128xf32> to vector<72x128xf32>
    %cst_67 = arith.constant dense<0.000000e+00> : vector<16x128xf32>
    %138 = tpu.matmul %135, %137, %cst_67 {dimension_numbers = #tpu.dot_dimension_numbers<[1], [0], [0], [1], [0, 0, 1, 1], [], []>} : vector<16x72xf32>, vector<72x128xf32>, vector<16x128xf32> -> vector<16x128xf32>
    %c0_68 = arith.constant 0 : index
    %c1_69 = arith.constant 1 : index
    %c0_70 = arith.constant 0 : index
    %139 = vector.load %arg13[%c0_68, %c1_69, %c0_70] : memref<2x12x72xf32, #tpu.memory_space<vmem>>, vector<2x8x72xf32>
    %140 = vector.shape_cast %139 : vector<2x8x72xf32> to vector<16x72xf32>
    %c1_71 = arith.constant 1 : index
    %c0_72 = arith.constant 0 : index
    %c0_73 = arith.constant 0 : index
    %141 = vector.load %arg4[%c1_71, %c0_72, %c0_73] : memref<5x72x128xf32, #tpu.memory_space<vmem>>, vector<1x72x128xf32>
    %142 = vector.shape_cast %141 : vector<1x72x128xf32> to vector<72x128xf32>
    %cst_74 = arith.constant dense<0.000000e+00> : vector<16x128xf32>
    %143 = tpu.matmul %140, %142, %cst_74 {dimension_numbers = #tpu.dot_dimension_numbers<[1], [0], [0], [1], [0, 0, 1, 1], [], []>} : vector<16x72xf32>, vector<72x128xf32>, vector<16x128xf32> -> vector<16x128xf32>
    %144 = arith.addf %138, %143 : vector<16x128xf32>
    %c0_75 = arith.constant 0 : index
    %c2_76 = arith.constant 2 : index
    %c0_77 = arith.constant 0 : index
    %145 = vector.load %arg13[%c0_75, %c2_76, %c0_77] : memref<2x12x72xf32, #tpu.memory_space<vmem>>, vector<2x8x72xf32>
    %146 = vector.shape_cast %145 : vector<2x8x72xf32> to vector<16x72xf32>
    %c2_78 = arith.constant 2 : index
    %c0_79 = arith.constant 0 : index
    %c0_80 = arith.constant 0 : index
    %147 = vector.load %arg4[%c2_78, %c0_79, %c0_80] : memref<5x72x128xf32, #tpu.memory_space<vmem>>, vector<1x72x128xf32>
    %148 = vector.shape_cast %147 : vector<1x72x128xf32> to vector<72x128xf32>
    %cst_81 = arith.constant dense<0.000000e+00> : vector<16x128xf32>
    %149 = tpu.matmul %146, %148, %cst_81 {dimension_numbers = #tpu.dot_dimension_numbers<[1], [0], [0], [1], [0, 0, 1, 1], [], []>} : vector<16x72xf32>, vector<72x128xf32>, vector<16x128xf32> -> vector<16x128xf32>
    %150 = arith.addf %144, %149 : vector<16x128xf32>
    %c0_82 = arith.constant 0 : index
    %c3_83 = arith.constant 3 : index
    %c0_84 = arith.constant 0 : index
    %151 = vector.load %arg13[%c0_82, %c3_83, %c0_84] : memref<2x12x72xf32, #tpu.memory_space<vmem>>, vector<2x8x72xf32>
    %152 = vector.shape_cast %151 : vector<2x8x72xf32> to vector<16x72xf32>
    %c3_85 = arith.constant 3 : index
    %c0_86 = arith.constant 0 : index
    %c0_87 = arith.constant 0 : index
    %153 = vector.load %arg4[%c3_85, %c0_86, %c0_87] : memref<5x72x128xf32, #tpu.memory_space<vmem>>, vector<1x72x128xf32>
    %154 = vector.shape_cast %153 : vector<1x72x128xf32> to vector<72x128xf32>
    %cst_88 = arith.constant dense<0.000000e+00> : vector<16x128xf32>
    %155 = tpu.matmul %152, %154, %cst_88 {dimension_numbers = #tpu.dot_dimension_numbers<[1], [0], [0], [1], [0, 0, 1, 1], [], []>} : vector<16x72xf32>, vector<72x128xf32>, vector<16x128xf32> -> vector<16x128xf32>
    %156 = arith.addf %150, %155 : vector<16x128xf32>
    %c0_89 = arith.constant 0 : index
    %c4_90 = arith.constant 4 : index
    %c0_91 = arith.constant 0 : index
    %157 = vector.load %arg13[%c0_89, %c4_90, %c0_91] : memref<2x12x72xf32, #tpu.memory_space<vmem>>, vector<2x8x72xf32>
    %158 = vector.shape_cast %157 : vector<2x8x72xf32> to vector<16x72xf32>
    %c4_92 = arith.constant 4 : index
    %c0_93 = arith.constant 0 : index
    %c0_94 = arith.constant 0 : index
    %159 = vector.load %arg4[%c4_92, %c0_93, %c0_94] : memref<5x72x128xf32, #tpu.memory_space<vmem>>, vector<1x72x128xf32>
    %160 = vector.shape_cast %159 : vector<1x72x128xf32> to vector<72x128xf32>
    %cst_95 = arith.constant dense<0.000000e+00> : vector<16x128xf32>
    %161 = tpu.matmul %158, %160, %cst_95 {dimension_numbers = #tpu.dot_dimension_numbers<[1], [0], [0], [1], [0, 0, 1, 1], [], []>} : vector<16x72xf32>, vector<72x128xf32>, vector<16x128xf32> -> vector<16x128xf32>
    %162 = arith.addf %156, %161 : vector<16x128xf32>
    %163 = vector.extract_strided_slice %162 {offsets = [0, 0], sizes = [16, 64], strides = [1, 1]} : vector<16x128xf32> to vector<16x64xf32>
    %164 = vector.extract_strided_slice %162 {offsets = [0, 64], sizes = [16, 64], strides = [1, 1]} : vector<16x128xf32> to vector<16x64xf32>
    %165 = arith.maximumf %163, %164 : vector<16x64xf32>
    %c0_96 = arith.constant 0 : index
    %c0_97 = arith.constant 0 : index
    %166 = vector.load %arg5[%c0_96, %c0_97] : memref<1x64xf32, #tpu.memory_space<vmem>>, vector<1x64xf32>
    %167 = vector.broadcast %166 : vector<1x64xf32> to vector<16x64xf32>
    %168 = arith.addf %165, %167 : vector<16x64xf32>
    %cst_98 = arith.constant 0.000000e+00 : f32
    %169 = vector.broadcast %cst_98 : f32 to vector<16x64xf32>
    %170 = arith.maximumf %168, %169 : vector<16x64xf32>
    %171 = vector.shape_cast %170 : vector<16x64xf32> to vector<2x8x64xf32>
    %172 = vector.extract_strided_slice %171 {offsets = [0, 0, 0], sizes = [2, 1, 64], strides = [1, 1, 1]} : vector<2x8x64xf32> to vector<2x1x64xf32>
    %173 = vector.shape_cast %172 : vector<2x1x64xf32> to vector<2x64xf32>
    %174 = vector.extract_strided_slice %171 {offsets = [0, 1, 0], sizes = [2, 1, 64], strides = [1, 1, 1]} : vector<2x8x64xf32> to vector<2x1x64xf32>
    %175 = vector.shape_cast %174 : vector<2x1x64xf32> to vector<2x64xf32>
    %176 = arith.maximumf %173, %175 : vector<2x64xf32>
    %c0_99 = arith.constant 0 : index
    %c0_100 = arith.constant 0 : index
    %177 = vector.load %arg14[%c0_99, %c0_100] : memref<2x256xf32, #tpu.memory_space<vmem>>, vector<2x64xf32>
    tpu.vector_store %arg14[%c0_99, %c0_100], %176 {strides = array<i32>} : memref<2x256xf32, #tpu.memory_space<vmem>>, vector<2x64xf32>,
    %178 = vector.extract_strided_slice %171 {offsets = [0, 2, 0], sizes = [2, 1, 64], strides = [1, 1, 1]} : vector<2x8x64xf32> to vector<2x1x64xf32>
    %179 = vector.shape_cast %178 : vector<2x1x64xf32> to vector<2x64xf32>
    %180 = vector.extract_strided_slice %171 {offsets = [0, 3, 0], sizes = [2, 1, 64], strides = [1, 1, 1]} : vector<2x8x64xf32> to vector<2x1x64xf32>
    %181 = vector.shape_cast %180 : vector<2x1x64xf32> to vector<2x64xf32>
    %182 = arith.maximumf %179, %181 : vector<2x64xf32>
    %c0_101 = arith.constant 0 : index
    %c64 = arith.constant 64 : index
    %183 = vector.load %arg14[%c0_101, %c64] : memref<2x256xf32, #tpu.memory_space<vmem>>, vector<2x64xf32>
    tpu.vector_store %arg14[%c0_101, %c64], %182 {strides = array<i32>} : memref<2x256xf32, #tpu.memory_space<vmem>>, vector<2x64xf32>,
    %184 = vector.extract_strided_slice %171 {offsets = [0, 4, 0], sizes = [2, 1, 64], strides = [1, 1, 1]} : vector<2x8x64xf32> to vector<2x1x64xf32>
    %185 = vector.shape_cast %184 : vector<2x1x64xf32> to vector<2x64xf32>
    %186 = vector.extract_strided_slice %171 {offsets = [0, 5, 0], sizes = [2, 1, 64], strides = [1, 1, 1]} : vector<2x8x64xf32> to vector<2x1x64xf32>
    %187 = vector.shape_cast %186 : vector<2x1x64xf32> to vector<2x64xf32>
    %188 = arith.maximumf %185, %187 : vector<2x64xf32>
    %c0_102 = arith.constant 0 : index
    %c128 = arith.constant 128 : index
    %189 = vector.load %arg14[%c0_102, %c128] : memref<2x256xf32, #tpu.memory_space<vmem>>, vector<2x64xf32>
    tpu.vector_store %arg14[%c0_102, %c128], %188 {strides = array<i32>} : memref<2x256xf32, #tpu.memory_space<vmem>>, vector<2x64xf32>,
    %190 = vector.extract_strided_slice %171 {offsets = [0, 6, 0], sizes = [2, 1, 64], strides = [1, 1, 1]} : vector<2x8x64xf32> to vector<2x1x64xf32>
    %191 = vector.shape_cast %190 : vector<2x1x64xf32> to vector<2x64xf32>
    %192 = vector.extract_strided_slice %171 {offsets = [0, 7, 0], sizes = [2, 1, 64], strides = [1, 1, 1]} : vector<2x8x64xf32> to vector<2x1x64xf32>
    %193 = vector.shape_cast %192 : vector<2x1x64xf32> to vector<2x64xf32>
    %194 = arith.maximumf %191, %193 : vector<2x64xf32>
    %c0_103 = arith.constant 0 : index
    %c192 = arith.constant 192 : index
    %195 = vector.load %arg14[%c0_103, %c192] : memref<2x256xf32, #tpu.memory_space<vmem>>, vector<2x64xf32>
    tpu.vector_store %arg14[%c0_103, %c192], %194 {strides = array<i32>} : memref<2x256xf32, #tpu.memory_space<vmem>>, vector<2x64xf32>,
    %c0_104 = arith.constant 0 : index
    %c0_105 = arith.constant 0 : index
    %196 = vector.load %arg14[%c0_104, %c0_105] : memref<2x256xf32, #tpu.memory_space<vmem>>, vector<2x256xf32>
    %c0_106 = arith.constant 0 : index
    %c0_107 = arith.constant 0 : index
    %197 = vector.load %arg6[%c0_106, %c0_107] : memref<256x120xf32, #tpu.memory_space<vmem>>, vector<256x120xf32>
    %cst_108 = arith.constant dense<0.000000e+00> : vector<2x120xf32>
    %198 = tpu.matmul %196, %197, %cst_108 {dimension_numbers = #tpu.dot_dimension_numbers<[1], [0], [0], [1], [0, 0, 1, 1], [], []>} : vector<2x256xf32>, vector<256x120xf32>, vector<2x120xf32> -> vector<2x120xf32>
    %c0_109 = arith.constant 0 : index
    %c0_110 = arith.constant 0 : index
    %199 = vector.load %arg7[%c0_109, %c0_110] : memref<1x120xf32, #tpu.memory_space<vmem>>, vector<1x120xf32>
    %200 = vector.broadcast %199 : vector<1x120xf32> to vector<2x120xf32>
    %201 = arith.addf %198, %200 : vector<2x120xf32>
    %cst_111 = arith.constant 0.000000e+00 : f32
    %202 = vector.broadcast %cst_111 : f32 to vector<2x120xf32>
    %203 = arith.maximumf %201, %202 : vector<2x120xf32>
    %c0_112 = arith.constant 0 : index
    %c0_113 = arith.constant 0 : index
    %204 = vector.load %arg8[%c0_112, %c0_113] : memref<120x84xf32, #tpu.memory_space<vmem>>, vector<120x84xf32>
    %cst_114 = arith.constant dense<0.000000e+00> : vector<2x84xf32>
    %205 = tpu.matmul %203, %204, %cst_114 {dimension_numbers = #tpu.dot_dimension_numbers<[1], [0], [0], [1], [0, 0, 1, 1], [], []>} : vector<2x120xf32>, vector<120x84xf32>, vector<2x84xf32> -> vector<2x84xf32>
    %c0_115 = arith.constant 0 : index
    %c0_116 = arith.constant 0 : index
    %206 = vector.load %arg9[%c0_115, %c0_116] : memref<1x84xf32, #tpu.memory_space<vmem>>, vector<1x84xf32>
    %207 = vector.broadcast %206 : vector<1x84xf32> to vector<2x84xf32>
    %208 = arith.addf %205, %207 : vector<2x84xf32>
    %cst_117 = arith.constant 0.000000e+00 : f32
    %209 = vector.broadcast %cst_117 : f32 to vector<2x84xf32>
    %210 = arith.maximumf %208, %209 : vector<2x84xf32>
    %c0_118 = arith.constant 0 : index
    %c0_119 = arith.constant 0 : index
    %211 = vector.load %arg10[%c0_118, %c0_119] : memref<84x10xf32, #tpu.memory_space<vmem>>, vector<84x10xf32>
    %cst_120 = arith.constant dense<0.000000e+00> : vector<2x10xf32>
    %212 = tpu.matmul %210, %211, %cst_120 {dimension_numbers = #tpu.dot_dimension_numbers<[1], [0], [0], [1], [0, 0, 1, 1], [], []>} : vector<2x84xf32>, vector<84x10xf32>, vector<2x10xf32> -> vector<2x10xf32>
    %c0_121 = arith.constant 0 : index
    %c0_122 = arith.constant 0 : index
    %213 = vector.load %arg11[%c0_121, %c0_122] : memref<1x10xf32, #tpu.memory_space<vmem>>, vector<1x10xf32>
    %214 = vector.broadcast %213 : vector<1x10xf32> to vector<2x10xf32>
    %215 = arith.addf %212, %214 : vector<2x10xf32>
    %cst_123 = arith.constant 0.000000e+00 : f32
    %216 = vector.broadcast %cst_123 : f32 to vector<2x10xf32>
    %217 = arith.maximumf %215, %216 : vector<2x10xf32>
    %c0_124 = arith.constant 0 : index
    %c0_125 = arith.constant 0 : index
    %218 = vector.load %arg12[%c0_124, %c0_125] : memref<2x10xf32, #tpu.memory_space<vmem>>, vector<2x10xf32>
    tpu.vector_store %arg12[%c0_124, %c0_125], %217 {strides = array<i32>} : memref<2x10xf32, #tpu.memory_space<vmem>>, vector<2x10xf32>,
    return
  }
  func.func @transform_0(%arg0: i32) -> (i32, i32, i32) {
    %c0_i32 = arith.constant 0 : i32
    %c0_i32_0 = arith.constant 0 : i32
    %c0_i32_1 = arith.constant 0 : i32
    return %arg0, %c0_i32, %c0_i32_0 : i32, i32, i32
  }
  func.func @transform_1(%arg0: i32) -> (i32, i32, i32) {
    %c0_i32 = arith.constant 0 : i32
    %c0_i32_0 = arith.constant 0 : i32
    %c0_i32_1 = arith.constant 0 : i32
    %c0_i32_2 = arith.constant 0 : i32
    return %c0_i32, %c0_i32_0, %c0_i32_1 : i32, i32, i32
  }
  func.func @transform_2(%arg0: i32) -> (i32, i32) {
    %c0_i32 = arith.constant 0 : i32
    %c0_i32_0 = arith.constant 0 : i32
    %c0_i32_1 = arith.constant 0 : i32
    return %c0_i32, %c0_i32_0 : i32, i32
  }
  func.func @transform_3(%arg0: i32) -> (i32, i32, i32) {
    %c0_i32 = arith.constant 0 : i32
    %c0_i32_0 = arith.constant 0 : i32
    %c0_i32_1 = arith.constant 0 : i32
    %c0_i32_2 = arith.constant 0 : i32
    return %c0_i32, %c0_i32_0, %c0_i32_1 : i32, i32, i32
  }
  func.func @transform_4(%arg0: i32) -> (i32, i32) {
    %c0_i32 = arith.constant 0 : i32
    %c0_i32_0 = arith.constant 0 : i32
    %c0_i32_1 = arith.constant 0 : i32
    return %c0_i32, %c0_i32_0 : i32, i32
  }
  func.func @transform_5(%arg0: i32) -> (i32, i32) {
    %c0_i32 = arith.constant 0 : i32
    %c0_i32_0 = arith.constant 0 : i32
    %c0_i32_1 = arith.constant 0 : i32
    return %c0_i32, %c0_i32_0 : i32, i32
  }
  func.func @transform_6(%arg0: i32) -> (i32, i32) {
    %c0_i32 = arith.constant 0 : i32
    %c0_i32_0 = arith.constant 0 : i32
    %c0_i32_1 = arith.constant 0 : i32
    return %c0_i32, %c0_i32_0 : i32, i32
  }
  func.func @transform_7(%arg0: i32) -> (i32, i32) {
    %c0_i32 = arith.constant 0 : i32
    %c0_i32_0 = arith.constant 0 : i32
    %c0_i32_1 = arith.constant 0 : i32
    return %c0_i32, %c0_i32_0 : i32, i32
  }
  func.func @transform_8(%arg0: i32) -> (i32, i32) {
    %c0_i32 = arith.constant 0 : i32
    %c0_i32_0 = arith.constant 0 : i32
    %c0_i32_1 = arith.constant 0 : i32
    return %c0_i32, %c0_i32_0 : i32, i32
  }
  func.func @transform_9(%arg0: i32) -> (i32, i32) {
    %c0_i32 = arith.constant 0 : i32
    %c0_i32_0 = arith.constant 0 : i32
    %c0_i32_1 = arith.constant 0 : i32
    return %c0_i32, %c0_i32_0 : i32, i32
  }
  func.func @transform_10(%arg0: i32) -> (i32, i32) {
    %c0_i32 = arith.constant 0 : i32
    %c0_i32_0 = arith.constant 0 : i32
    %c0_i32_1 = arith.constant 0 : i32
    return %c0_i32, %c0_i32_0 : i32, i32
  }
  func.func @transform_11(%arg0: i32) -> (i32, i32) {
    %c0_i32 = arith.constant 0 : i32
    %c0_i32_0 = arith.constant 0 : i32
    return %arg0, %c0_i32 : i32, i32
  }
}

</mosaic_0001>

<bundles_post_ra>
// kernel: lenet5_forward.1
= control target key start
LH: loop header
LB: loop body
LE: loop exit
PB: predicated region body
PF: predicated region fallthrough
CT: control target
= control target key end

     0   :  { %vm87_vm0 = vcmask 1043456   ;;  %vm68_vm1 = vcmask 228352   ;;  %s2253_s0 = inlined_call_operand.vmem [shape: f32[2,28,28], index: 0, kind: input, shape index: {}]   ;;  %s2254_s1 = inlined_call_operand.vmem [shape: f32[5,28,144], index: 1, kind: input, shape index: {}]   ;;  %s2255_s2 = inlined_call_operand.vmem [shape: f32[1,72], index: 2, kind: input, shape index: {}]   ;;  %s2256_s3 = inlined_call_operand.vmem [shape: f32[5,72,128], index: 3, kind: input, shape index: {}]   ;;  %s2257_s4 = inlined_call_operand.vmem [shape: f32[1,64], index: 4, kind: input, shape index: {}]   ;;  %s2258_s5 = inlined_call_operand.vmem [shape: f32[256,120], index: 5, kind: input, shape index: {}]   ;;  %s2259_s6 = inlined_call_operand.vmem [shape: f32[1,120], index: 6, kind: input, shape index: {}]   ;;  %s2260_s7 = inlined_call_operand.vmem [shape: f32[120,84], index: 7, kind: input, shape index: {}]   ;;  %s2261_s8 = inlined_call_operand.vmem [shape: f32[1,84], index: 8, kind: input, shape index: {}]   ;;  %s2262_s9 = inlined_call_operand.vmem [shape: f32[84,10], index: 9, kind: input, shape index: {}]   ;;  %s2263_s10 = inlined_call_operand.vmem [shape: f32[1,10], index: 10, kind: input, shape index: {}]   ;;  %s2264_s11 = inlined_call_operand.hbm [shape: f32[2,10], index: 11, kind: output, shape index: {}]  }
   0x1   :  { %v1244_v0 = vld [vmem:[%s2254_s1 + $0x70] sm:$0xf]  ;;  %v1245_v1 = vld [vmem:[%s2254_s1 + $0x78] sm:$0xf]  ;;  %v1242_v2 = vld [vmem:[%s2254_s1 + $0x60] sm:$0xff] }
   0x2   :  { %1246 = vmatpush.msk.msra.mxu0 %vm87_vm0, %v1244_v0  ;;  %1253 = vmatpush.msk.msra.mxu1 %vm87_vm0, %v1245_v1  ;;  %v52_v3 = vld [vmem:[%s2254_s1 + $0x38] sm:$0xf]  ;;  %v1243_v4 = vld [vmem:[%s2254_s1 + $0x68] sm:$0xff]  ;;  %v51_v5 = vld [vmem:[%s2254_s1 + $0x30] sm:$0xf] }
   0x3   :  { %1267 = vmatpush.msk.msra.mxu3 %vm87_vm0, %v52_v3  ;;  %1389 = vmatpush.msk.msra.mxu2 %vm87_vm0, %v51_v5  ;;  %v50_v6 = vld [vmem:[%s2254_s1 + $0x28] sm:$0xff]  ;;  %v1240_v7 = vld [vmem:[%s2254_s1 + $0x50] sm:$0xff]  ;;  %v1241_v8 = vld [vmem:[%s2254_s1 + $0x58] sm:$0xff] }
   0x4   :  { %107 = vmatpush.msra.mxu0 %v1242_v2  ;;  %142 = vmatpush.msra.mxu1 %v1243_v4  ;;  %v49_v9 = vld [vmem:[%s2254_s1 + $0x20] sm:$0xff]  ;;  %v48_v10 = vld [vmem:[%s2254_s1 + $0x18] sm:$0xff]  ;;  %v1239_v12 = vld [vmem:[%s2254_s1 + $0x48] sm:$0xff] }
   0x5   :  { %236 = vmatpush.msra.mxu3 %v50_v6  ;;  %1390 = vmatpush.msra.mxu2 %v49_v9  ;;  %v1238_v11 = vld [vmem:[%s2254_s1 + $0x40] sm:$0xff]  ;;  %v47_v13 = vld [vmem:[%s2254_s1 + $0x10] sm:$0xff]  ;;  %v46_v14 = vld [vmem:[%s2254_s1 + $0x8] sm:$0xff] }
   0x6   :  { %108 = vmatpush.msra.mxu0 %v1240_v7  ;;  %143 = vmatpush.msra.mxu1 %v1241_v8  ;;  %v53_v15 = vld [vmem:[%s2253_s0 + $0x1] sm:$0xff]  ;;  %v1281_v19 = vld [vmem:[%s2254_s1 + $0xb8] sm:$0xf] }
   0x7   :  { %237 = vmatpush.msra.mxu3 %v48_v10  ;;  %1391 = vmatpush.msra.mxu2 %v47_v13  ;;  %v1545_v16 = vld [vmem:[%s2253_s0] sm:$0xff]  ;;  %v40_v18 = vld [vmem:[%s2253_s0 + $0x8] sm:$0xff] }
   0x8   :  { %109 = vmatpush.msra.mxu0 %v1238_v11  ;;  %144 = vmatpush.msra.mxu1 %v1239_v12  ;;  %v45_v17 = vld [vmem:[%s2254_s1] sm:$0xff]  ;;  %v1279_v20 = vld [vmem:[%s2254_s1 + $0xa8] sm:$0xff] }
   0x9   :  { %238 = vmatpush.msra.mxu3 %v46_v14  ;;  %1247 = vmatmul.msk.f32.vlgmr.msra.gmra.mxu0 %vm68_vm1, %v53_v15 }
   0xa   :  { %1254 = vmatmul.msk.f32.vlgmr.msra.gmra.mxu1 %vm68_vm1, %v53_v15  ;;  %1260 = vmatpush.msk.msrb.mxu0 %vm87_vm0, %v51_v5 }
   0xb   :  { %1268 = vmatmul.msk.f32.vlgmr.msra.gmra.mxu3 %vm68_vm1, %v1545_v16  ;;  %1392 = vmatpush.msra.mxu2 %v45_v17 }
   0xc   :  { %1262 = vmatmul.msk.f32.vlgmr.msra.gmra.mxu2 %vm68_vm1, %v40_v18  ;;  %201 = vmatpush.msrb.mxu0 %v49_v9 }
   0xd   :  { %16 = vsyncpa [#allocation5], 0  ;;  %1289 = vmatpush.msk.msrb.mxu1 %vm87_vm0, %v1281_v19  ;;  %v54_v21 = vld [vmem:[%s2253_s0 + $0x9] sm:$0xff]  ;;  %v1277_v23 = vld [vmem:[%s2254_s1 + $0x98] sm:$0xff]  ;;  %vm657_vm2 = vcmask 457728   ;;  %vm700_vm3 = vcmask 581632  }
   0xe   :  { %202 = vmatpush.msrb.mxu0 %v47_v13  ;;  %v41_v22 = vld [vmem:[%s2253_s0 + $0x10] sm:$0xff]  ;;  %v1303_v24 = vld [vmem:[%s2254_s1 + $0xf8] sm:$0xf]  ;;  %v1301_v25 = vld [vmem:[%s2254_s1 + $0xe8] sm:$0xff]  ;;  %vm703_vm4 = vcmask 583682   ;;  %vm706_vm5 = vcmask 585732  }
   0xf   :  { %345 = vmatpush.msrb.mxu1 %v1279_v20  ;;  %v1302_v26 = vld [vmem:[%s2254_s1 + $0xf0] sm:$0xf]  ;;  %v1275_v27 = vld [vmem:[%s2254_s1 + $0x88] sm:$0xff]  ;;  %1311 = vmatpush.msk.msrb.mxu3 %vm87_vm0, %v1303_v24  ;;  %v1300_v28 = vld [vmem:[%s2254_s1 + $0xe0] sm:$0xff]  ;;  %vm709_vm6 = vcmask 587782   ;;  %vm767_vm7 = vcmask 588800  }
  0x10   :  { %203 = vmatpush.msrb.mxu0 %v45_v17  ;;  %1304 = vmatpush.msk.msrb.mxu2 %vm87_vm0, %v1302_v26  ;;  %v55_v29 = vld [vmem:[%s2253_s0 + $0x11] sm:$0xff]  ;;  %v42_v31 = vld [vmem:[%s2253_s0 + $0x20] sm:$0xff]  ;;  %v1297_v32 = vld [vmem:[%s2254_s1 + $0xc8] sm:$0xff]  ;;  %vm988_vm8 = vcmask 1041409   ;;  %vm990_vm9 = vcmask 1043459   ;;  %vm992_vm10 = vcmask 1045509  }
  0x11   :  { %1248 = vmatmul.msk.f32.gmra.mxu0 %vm68_vm1, %v54_v21  ;;  %346 = vmatpush.msrb.mxu1 %v1277_v23  ;;  %v1299_v30 = vld [vmem:[%s2254_s1 + $0xd8] sm:$0xff]  ;;  %v1280_v33 = vld [vmem:[%s2254_s1 + $0xb0] sm:$0xf]  ;;  %v1278_v35 = vld [vmem:[%s2254_s1 + $0xa0] sm:$0xff]  ;;  %vm994_vm11 = vcmask 1047559   ;;  %vm997_vm12 = vcmask 517120  }
  0x12   :  { %1255 = vmatmul.msk.f32.gmra.mxu1 %vm68_vm1, %v54_v21  ;;  %466 = vmatpush.msrb.mxu3 %v1301_v25  ;;  %v1298_v34 = vld [vmem:[%s2254_s1 + $0xd0] sm:$0xff]  ;;  %v1296_v36 = vld [vmem:[%s2254_s1 + $0xc0] sm:$0xff]  ;;  %v43_v40 = vld [vmem:[%s2253_s0 + $0x28] sm:$0xff]  ;;  %vm1015_vm13 = vcmask 1041920   ;;  %vm1152_vm14 = vcmask 982016   ;;  %vm1192_vm15 = vcmask 687104  }
  0x13   :  { %1269 = vmatmul.msk.f32.gmra.mxu3 %vm68_vm1, %v40_v18  ;;  %347 = vmatpush.msrb.mxu1 %v1275_v27  ;;  %v1276_v37 = vld [vmem:[%s2254_s1 + $0x90] sm:$0xff]  ;;  %v56_v38 = vld [vmem:[%s2253_s0 + $0x21] sm:$0xff]  ;;  %v1325_v43 = vld [vmem:[%s2254_s1 + $0x138] sm:$0xf]  ;;  %s1429_s27 = smov [#allocation4]  }
  0x14   :  { %1263 = vmatmul.msk.f32.gmra.mxu2 %vm68_vm1, %v41_v22  ;;  %467 = vmatpush.msrb.mxu3 %v1299_v30  ;;  %v1274_v39 = vld [vmem:[%s2254_s1 + $0x80] sm:$0xff]  ;;  %v57_v41 = vld [vmem:[%s2253_s0 + $0x29] sm:$0xff]  ;;  %v58_v44 = vld [vmem:[%s2253_s0 + $0x31] sm:$0xff]  ;;  %s1227_s28 = sshll.u32 %s1429_s27, 4  ;;  %s1228_s28 = int_to_ptr.vmem [resolvable:$true] %s1227_s28 }
  0x15   :  { %431 = vmatpush.msrb.mxu2 %v1300_v28  ;;  %1282 = vmatpush.msk.msra.mxu0 %vm87_vm0, %v1280_v33  ;;  %v44_v42 = vld [vmem:[%s2253_s0 + $0x30] sm:$0xff]  ;;  %v379_v45 = vld [vmem:[%s2253_s0 + $0x3] sm:$0xff]  ;;  %v1321_v54 = vld [vmem:[%s2254_s1 + $0x118] sm:$0xff] }
  0x16   :  { %468 = vmatpush.msrb.mxu3 %v1297_v32  ;;  %1333 = vmatpush.msk.msra.mxu1 %vm87_vm0, %v1325_v43  ;;  %v1323_v46 = vld [vmem:[%s2254_s1 + $0x128] sm:$0xff]  ;;  %v1324_v48 = vld [vmem:[%s2254_s1 + $0x130] sm:$0xf]  ;;  %v1322_v49 = vld [vmem:[%s2254_s1 + $0x120] sm:$0xff] }
  0x17   :  { %432 = vmatpush.msrb.mxu2 %v1298_v34  ;;  %310 = vmatpush.msra.mxu0 %v1278_v35  ;;  %v258_v47 = vld [vmem:[%s2253_s0 + $0x2] sm:$0xff]  ;;  %v380_v50 = vld [vmem:[%s2253_s0 + $0xb] sm:$0xff]  ;;  %v381_v53 = vld [vmem:[%s2253_s0 + $0x13] sm:$0xff] }
  0x18   :  { %587 = vmatpush.msra.mxu1 %v1323_v46  ;;  %v1320_v51 = vld [vmem:[%s2254_s1 + $0x110] sm:$0xff]  ;;  %v1318_v55 = vld [vmem:[%s2254_s1 + $0x100] sm:$0xff]  ;;  %v1319_v56 = vld [vmem:[%s2254_s1 + $0x108] sm:$0xff] }
  0x19   :  { %1249 = vmatmul.msk.f32.gmra.mxu0 %vm68_vm1, %v55_v29  ;;  %433 = vmatpush.msrb.mxu2 %v1296_v36  ;;  %v259_v52 = vld [vmem:[%s2253_s0 + $0xa] sm:$0xff]  ;;  %v260_v57 = vld [vmem:[%s2253_s0 + $0x12] sm:$0xff]  ;;  %v261_v59 = vld [vmem:[%s2253_s0 + $0x22] sm:$0xff] }
  0x1a   :  { %1256 = vmatmul.msk.f32.gmra.mxu1 %vm68_vm1, %v55_v29  ;;  %311 = vmatpush.msra.mxu0 %v1276_v37  ;;  %v382_v58 = vld [vmem:[%s2253_s0 + $0x23] sm:$0xff]  ;;  %v383_v60 = vld [vmem:[%s2253_s0 + $0x2b] sm:$0xff]  ;;  %v384_v62 = vld [vmem:[%s2253_s0 + $0x33] sm:$0xff] }
  0x1b   :  { %1270 = vmatmul.msk.f32.gmra.mxu3 %vm68_vm1, %v41_v22  ;;  %588 = vmatpush.msra.mxu1 %v1321_v54  ;;  %v262_v61 = vld [vmem:[%s2253_s0 + $0x2a] sm:$0xff]  ;;  %v263_v63 = vld [vmem:[%s2253_s0 + $0x32] sm:$0xff] }
  0x1c   :  { %1264 = vmatmul.msk.f32.gmra.mxu2 %vm68_vm1, %v42_v31  ;;  %312 = vmatpush.msra.mxu0 %v1274_v39  ;;  %v500_v0 = vld [vmem:[%s2253_s0 + $0x4] sm:$0xff]  ;;  %v501_v1 = vld [vmem:[%s2253_s0 + $0xc] sm:$0xff]  ;;  %v502_v2 = vld [vmem:[%s2253_s0 + $0x14] sm:$0xff] }
  0x1d   :  { %589 = vmatpush.msra.mxu1 %v1319_v56  ;;  %v503_v3 = vld [vmem:[%s2253_s0 + $0x24] sm:$0xff]  ;;  %v504_v6 = vld [vmem:[%s2253_s0 + $0x2c] sm:$0xff]  ;;  %v505_v9 = vld [vmem:[%s2253_s0 + $0x34] sm:$0xff]  ;;  %s1427_s0 = smov 56  }
  0x21   :  { %1250 = vmatmul.msk.f32.gmra.mxu0 %vm68_vm1, %v56_v38 }
  0x22   :  { %1257 = vmatmul.msk.f32.gmra.mxu1 %vm68_vm1, %v56_v38 }
  0x23   :  { %1271 = vmatmul.msk.f32.gmra.mxu3 %vm68_vm1, %v42_v31 }
  0x24   :  { %1265 = vmatmul.msk.f32.gmra.mxu2 %vm68_vm1, %v43_v40 }
  0x29   :  { %1251 = vmatmul.msk.f32.gmra.mxu0 %vm68_vm1, %v57_v41 }
  0x2a   :  { %1258 = vmatmul.msk.f32.gmra.mxu1 %vm68_vm1, %v57_v41 }
  0x2b   :  { %1272 = vmatmul.msk.f32.gmra.mxu3 %vm68_vm1, %v43_v40 }
  0x2c   :  { %1266 = vmatmul.msk.f32.gmra.mxu2 %vm68_vm1, %v44_v42 }
  0x31   :  { %1252 = vmatmul.msk.f32.gmra.mxu0 %vm68_vm1, %v58_v44 }
  0x32   :  { %1259 = vmatmul.msk.f32.gmra.mxu1 %vm68_vm1, %v58_v44 }
  0x33   :  { %1273 = vmatmul.msk.f32.gmra.mxu3 %vm68_vm1, %v44_v42 }
  0x34   :  { %1305 = vmatmul.msk.f32.vlgmr.msrb.gmra.mxu2 %vm68_vm1, %v379_v45 }
  0x39   :  { %1261 = vmatmul.msk.f32.vlgmr.msrb.gmra.mxu0 %vm68_vm1, %v1545_v16 }
  0x3a   :  { %1290 = vmatmul.msk.f32.vlgmr.msrb.gmra.mxu1 %vm68_vm1, %v258_v47  ;;  %1326 = vmatpush.msk.msrb.mxu0 %vm87_vm0, %v1324_v48 }
  0x3b   :  { %1312 = vmatmul.msk.f32.vlgmr.msrb.gmra.mxu3 %vm68_vm1, %v379_v45 }
  0x3c   :  { %1306 = vmatmul.msk.f32.gmra.mxu2 %vm68_vm1, %v380_v50  ;;  %552 = vmatpush.msrb.mxu0 %v1322_v49 }
  0x3e   :  { %553 = vmatpush.msrb.mxu0 %v1320_v51 }
  0x40   :  { %554 = vmatpush.msrb.mxu0 %v1318_v55 }
  0x41   :  { %1283 = vmatmul.msk.f32.vlgmr.msra.gmra.mxu0 %vm68_vm1, %v258_v47 }
  0x42   :  { %1291 = vmatmul.msk.f32.gmra.mxu1 %vm68_vm1, %v259_v52 }
  0x43   :  { %1313 = vmatmul.msk.f32.gmra.mxu3 %vm68_vm1, %v380_v50 }
  0x44   :  { %1307 = vmatmul.msk.f32.gmra.mxu2 %vm68_vm1, %v381_v53 }
  0x49   :  { %1284 = vmatmul.msk.f32.gmra.mxu0 %vm68_vm1, %v259_v52 }
  0x4a   :  { %1292 = vmatmul.msk.f32.gmra.mxu1 %vm68_vm1, %v260_v57 }
  0x4b   :  { %1314 = vmatmul.msk.f32.gmra.mxu3 %vm68_vm1, %v381_v53 }
  0x4c   :  { %1308 = vmatmul.msk.f32.gmra.mxu2 %vm68_vm1, %v382_v58 }
  0x51   :  { %1285 = vmatmul.msk.f32.gmra.mxu0 %vm68_vm1, %v260_v57 }
  0x52   :  { %1293 = vmatmul.msk.f32.gmra.mxu1 %vm68_vm1, %v261_v59 }
  0x53   :  { %1315 = vmatmul.msk.f32.gmra.mxu3 %vm68_vm1, %v382_v58 }
  0x54   :  { %1309 = vmatmul.msk.f32.gmra.mxu2 %vm68_vm1, %v383_v60 }
  0x59   :  { %1286 = vmatmul.msk.f32.gmra.mxu0 %vm68_vm1, %v261_v59 }
  0x5a   :  { %1294 = vmatmul.msk.f32.gmra.mxu1 %vm68_vm1, %v262_v61 }
  0x5b   :  { %1316 = vmatmul.msk.f32.gmra.mxu3 %vm68_vm1, %v383_v60 }
  0x5c   :  { %1310 = vmatmul.msk.f32.gmra.mxu2 %vm68_vm1, %v384_v62 }
  0x61   :  { %1287 = vmatmul.msk.f32.gmra.mxu0 %vm68_vm1, %v262_v61 }
  0x62   :  { %1295 = vmatmul.msk.f32.gmra.mxu1 %vm68_vm1, %v263_v63 }
  0x63   :  { %1317 = vmatmul.msk.f32.gmra.mxu3 %vm68_vm1, %v384_v62 }
  0x69   :  { %1288 = vmatmul.msk.f32.gmra.mxu0 %vm68_vm1, %v263_v63 }
  0x6a   :  { %1334 = vmatmul.msk.f32.vlgmr.msra.gmra.mxu1 %vm68_vm1, %v500_v0 }
  0x71   :  { %1327 = vmatmul.msk.f32.vlgmr.msrb.gmra.mxu0 %vm68_vm1, %v500_v0 }
  0x72   :  { %1335 = vmatmul.msk.f32.gmra.mxu1 %vm68_vm1, %v501_v1 }
  0x79   :  { %1328 = vmatmul.msk.f32.gmra.mxu0 %vm68_vm1, %v501_v1 }
  0x7a   :  { %1336 = vmatmul.msk.f32.gmra.mxu1 %vm68_vm1, %v502_v2 }
  0x81   :  { %1329 = vmatmul.msk.f32.gmra.mxu0 %vm68_vm1, %v502_v2 }
  0x82   :  { %1337 = vmatmul.msk.f32.gmra.mxu1 %vm68_vm1, %v503_v3 }
  0x86   :  { %v111_v4 = vpop.f32.mrf.mxu0 }
  0x87   :  { %v146_v5 = vpop.f32.mrf.mxu1 }
  0x89   :  { %1330 = vmatmul.msk.f32.gmra.mxu0 %vm68_vm1, %v503_v3 }
  0x8a   :  { %1338 = vmatmul.msk.f32.gmra.mxu1 %vm68_vm1, %v504_v6 }
  0x8e   :  { %v114_v7 = vpop.f32.mrf.mxu0  ;;  %v240_v14 = vpop.f32.mrf.mxu3 }
  0x8f   :  { %v149_v8 = vpop.f32.mrf.mxu1  ;;  %v208_v20 = vpop.f32.mrf.mxu2  ;;  %v241_v43 = vadd.f32 %v240_v14, %v146_v5 }
  0x90   :  { %v209_v58 = vadd.f32 %v208_v20, %v114_v7 }
  0x91   :  { %1331 = vmatmul.msk.f32.gmra.mxu0 %vm68_vm1, %v504_v6 }
  0x92   :  { %1339 = vmatmul.msk.f32.gmra.mxu1 %vm68_vm1, %v505_v9 }
  0x96   :  { %v1774_v10 = vpop.f32.mrf.mxu0  ;;  %v243_v17 = vpop.f32.mrf.mxu3 }
  0x97   :  { %v152_v11 = vpop.f32.mrf.mxu1  ;;  %v211_v24 = vpop.f32.mrf.mxu2  ;;  %v244_v52 = vadd.f32 %v243_v17, %v149_v8 }
  0x98   :  { %v212_v6 = vadd.f32 %v211_v24, %v1774_v10 }
  0x99   :  { %1332 = vmatmul.msk.f32.gmra.mxu0 %vm68_vm1, %v505_v9 }
  0x9e   :  { %v1777_v12 = vpop.f32.mrf.mxu0  ;;  %v246_v21 = vpop.f32.mrf.mxu3 }
  0x9f   :  { %v1779_v13 = vpop.f32.mrf.mxu1  ;;  %v214_v28 = vpop.f32.mrf.mxu2  ;;  %v247_v0 = vadd.f32 %v246_v21, %v152_v11 }
  0xa0   :  { %v215_v10 = vadd.f32 %v214_v28, %v1777_v12 }
  0xa6   :  { %v1781_v15 = vpop.f32.mrf.mxu0  ;;  %v249_v26 = vpop.f32.mrf.mxu3 }
  0xa7   :  { %v1783_v16 = vpop.f32.mrf.mxu1  ;;  %v1791_v32 = vpop.f32.mrf.mxu2  ;;  %v250_v17 = vadd.f32 %v249_v26, %v1779_v13 }
  0xae   :  { %v1785_v18 = vpop.f32.mrf.mxu0  ;;  %v1789_v31 = vpop.f32.mrf.mxu3 }
  0xaf   :  { %v1787_v19 = vpop.f32.mrf.mxu1  ;;  %v1797_v38 = vpop.f32.mrf.mxu2  ;;  %v253_v12 = vadd.f32 %v1789_v31, %v1783_v16 }
  0xb6   :  { %v205_v22 = vpop.f32.mrf.mxu0  ;;  %v1793_v35 = vpop.f32.mrf.mxu3 }
  0xb7   :  { %v349_v23 = vpop.f32.mrf.mxu1  ;;  %v435_v42 = vpop.f32.mrf.mxu2  ;;  %v206_v47 = vadd.f32 %v205_v22, %v111_v4 }
  0xb8   :  { %v368_v44 = vadd.f32 %v349_v23, %v241_v43 }
  0xbe   :  { %v314_v25 = vpop.f32.mrf.mxu0  ;;  %v470_v39 = vpop.f32.mrf.mxu3 }
  0xbf   :  { %v352_v27 = vpop.f32.mrf.mxu1  ;;  %v489_v45 = vadd.f32 %v470_v39, %v368_v44  ;;  %v367_v51 = vadd.f32 %v314_v25, %v206_v47  ;;  %v438_v53 = vpop.f32.mrf.mxu2 }
  0xc0   :  { %v370_v54 = vadd.f32 %v352_v27, %v244_v52 }
  0xc1   :  { %v488_v55 = vadd.f32 %v435_v42, %v367_v51 }
  0xc6   :  { %v317_v29 = vpop.f32.mrf.mxu0  ;;  %v473_v48 = vpop.f32.mrf.mxu3 }
  0xc7   :  { %v355_v30 = vpop.f32.mrf.mxu1  ;;  %v491_v56 = vadd.f32 %v473_v48, %v370_v54  ;;  %v369_v62 = vadd.f32 %v317_v29, %v209_v58  ;;  %v441_v2 = vpop.f32.mrf.mxu2  ;;  %v751_v58 = vld [vmem:[%s2256_s3 + $0x28] sm:$0xff] }
  0xc8   :  { %v372_v1 = vadd.f32 %v355_v30, %v247_v0  ;;  %v1342_v0 = vld [vmem:[%s2256_s3 + $0x58] sm:$0xff] }
  0xc9   :  { %v490_v3 = vadd.f32 %v438_v53, %v369_v62  ;;  %v1343_v62 = vld [vmem:[%s2256_s3 + $0x60] sm:$0xff] }
  0xce   :  { %v320_v33 = vpop.f32.mrf.mxu0  ;;  %v476_v63 = vpop.f32.mrf.mxu3 }
  0xcf   :  { %v358_v34 = vpop.f32.mrf.mxu1  ;;  %v493_v4 = vadd.f32 %v476_v63, %v372_v1  ;;  %v371_v14 = vadd.f32 %v320_v33, %v212_v6  ;;  %v444_v23 = vpop.f32.mrf.mxu2  ;;  %v218_v33 = vadd.f32 %v1791_v32, %v1781_v15  ;;  %v221_v15 = vadd.f32 %v1797_v38, %v1785_v18  ;;  %v749_v63 = vld [vmem:[%s2256_s3 + $0x18] sm:$0xff] }
  0xd0   :  { %v374_v20 = vadd.f32 %v358_v34, %v250_v17  ;;  %v1340_v17 = vld [vmem:[%s2256_s3 + $0x48] sm:$0xff] }
  0xd1   :  { %v492_v21 = vadd.f32 %v441_v2, %v371_v14  ;;  %v1889_v2 = vld [vmem:[%s2255_s2] ss:$0 sm:$0xff] }
  0xd6   :  { %v323_v36 = vpop.f32.mrf.mxu0  ;;  %v479_v11 = vpop.f32.mrf.mxu3 }
  0xd7   :  { %v1795_v37 = vpop.f32.mrf.mxu1  ;;  %v495_v22 = vadd.f32 %v479_v11, %v374_v20  ;;  %v373_v30 = vadd.f32 %v323_v36, %v215_v10  ;;  %v447_v42 = vpop.f32.mrf.mxu2  ;;  %v746_v11 = vld [vmem:[%s2256_s3] sm:$0xff] }
  0xd8   :  { %v376_v43 = vadd.f32 %v1795_v37, %v253_v12 }
  0xd9   :  { %v494_v13 = vadd.f32 %v444_v23, %v373_v30 }
  0xde   :  { %v326_v40 = vpop.f32.mrf.mxu0  ;;  %v482_v39 = vpop.f32.mrf.mxu3 }
  0xdf   :  { %v1799_v41 = vpop.f32.mrf.mxu1  ;;  %v375_v28 = vadd.f32 %v326_v40, %v218_v33  ;;  %v497_v44 = vadd.f32 %v482_v39, %v376_v43  ;;  %v450_v37 = vpop.f32.mrf.mxu2 }
  0xe6   :  { %v1801_v46 = vpop.f32.mrf.mxu0  ;;  %v485_v31 = vpop.f32.mrf.mxu3 }
  0xe7   :  { %v591_v49 = vpop.f32.mrf.mxu1  ;;  %v377_v16 = vadd.f32 %v1801_v46, %v221_v15  ;;  %v753_v46 = vld [vmem:[%s2256_s3 + $0x38] sm:$0xff]  ;;  %v1360_v15 = vld [vmem:[%s2256_s3 + $0xc8] sm:$0xff] }
  0xe8   :  { %v610_v50 = vadd.f32 %v591_v49, %v489_v45  ;;  %v496_v45 = vadd.f32 %v447_v42, %v375_v28  ;;  %v256_v49 = vadd.f32 %v1793_v35, %v1787_v19  ;;  %v1348_v19 = vld [vmem:[%s2256_s3 + $0x88] sm:$0xff]  ;;  %v754_v35 = vld [vmem:[%s2256_s3 + $0x40] sm:$0xff]  ;;  %v1372_v42 = vld [vmem:[%s2256_s3 + $0x118] sm:$0xff] }
  0xe9   :  { %v498_v18 = vadd.f32 %v450_v37, %v377_v16  ;;  %781 = vmatpush.msra.mxu2 %v1348_v19  ;;  %810 = vmatpush.msra.mxu3 %v754_v35  ;;  %v1366_v37 = vld [vmem:[%s2256_s3 + $0xe8] sm:$0xff]  ;;  %v1364_v19 = vld [vmem:[%s2256_s3 + $0xd8] sm:$0xff] }
  0xea   :  { %635 = vrot.lane.b32.xlu0 %v610_v50, %s1427_s0  ;;  %v378_v40 = vadd.f32 %v1799_v41, %v256_v49  ;;  %v1347_v41 = vld [vmem:[%s2256_s3 + $0x80] sm:$0xff] }
  0xeb   :  { %782 = vmatpush.msra.mxu2 %v1347_v41  ;;  %811 = vmatpush.msra.mxu3 %v753_v46  ;;  %v1359_v49 = vld [vmem:[%s2256_s3 + $0xc0] sm:$0xff]  ;;  %v1356_v41 = vld [vmem:[%s2256_s3 + $0xa8] sm:$0xff] }
  0xec   :  { %v499_v51 = vadd.f32 %v485_v31, %v378_v40 }
  0xee   :  { %v556_v57 = vpop.f32.mrf.mxu0 }
  0xef   :  { %v1804_v59 = vadd.f32 %v556_v57, %v488_v55  ;;  %v594_v60 = vpop.f32.mrf.mxu1  ;;  %v1346_v55 = vld [vmem:[%s2256_s3 + $0x78] sm:$0xff]  ;;  %v1345_v57 = vld [vmem:[%s2256_s3 + $0x70] sm:$0xff] }
  0xf0   :  { %v612_v61 = vadd.f32 %v594_v60, %v491_v56  ;;  %v752_v56 = vld [vmem:[%s2256_s3 + $0x30] sm:$0xff]  ;;  %783 = vmatpush.msra.mxu2 %v1346_v55  ;;  %v1344_v60 = vld [vmem:[%s2256_s3 + $0x68] sm:$0xff] }
  0xf1   :  { %812 = vmatpush.msra.mxu3 %v752_v56 }
  0xf2   :  { %639 = vrot.lane.b32.xlu1 %v612_v61, %s1427_s0  ;;  %633 = vrot.lane.b32.xlu0 %v1804_v59, %s1427_s0  ;;  %v750_v61 = vld [vmem:[%s2256_s3 + $0x20] sm:$0xff] }
  0xf3   :  { %784 = vmatpush.msra.mxu2 %v1345_v57  ;;  %813 = vmatpush.msra.mxu3 %v751_v58  ;;  %v1355_v57 = vld [vmem:[%s2256_s3 + $0xa0] sm:$0xff] }
  0xf5   :  { %785 = vmatpush.msra.mxu2 %v1344_v60  ;;  %814 = vmatpush.msra.mxu3 %v750_v61 }
  0xf6   :  { %v559_v5 = vpop.f32.mrf.mxu0 }
  0xf7   :  { %v1810_v7 = vadd.f32 %v559_v5, %v490_v3  ;;  %v597_v8 = vpop.f32.mrf.mxu1  ;;  %786 = vmatpush.msra.mxu2 %v1343_v62  ;;  %815 = vmatpush.msra.mxu3 %v749_v63  ;;  %v1354_v62 = vld [vmem:[%s2256_s3 + $0x98] sm:$0xff] }
  0xf8   :  { %v614_v9 = vadd.f32 %v597_v8, %v493_v4  ;;  %v748_v4 = vld [vmem:[%s2256_s3 + $0x10] sm:$0xff] }
  0xf9   :  { %787 = vmatpush.msra.mxu2 %v1342_v0  ;;  %816 = vmatpush.msra.mxu3 %v748_v4  ;;  %v1341_v8 = vld [vmem:[%s2256_s3 + $0x50] sm:$0xff] }
  0xfa   :  { %643 = vrot.lane.b32.xlu2 %v614_v9, %s1427_s0  ;;  %637 = vrot.lane.b32.xlu1 %v1810_v7, %s1427_s0  ;;  %v747_v9 = vld [vmem:[%s2256_s3 + $0x8] sm:$0xff]  ;;  %v1353_v0 = vld [vmem:[%s2256_s3 + $0x90] sm:$0xff] }
  0xfb   :  { %788 = vmatpush.msra.mxu2 %v1341_v8  ;;  %817 = vmatpush.msra.mxu3 %v747_v9  ;;  %v1381_v9 = vld [vmem:[%s2256_s3 + $0x150] sm:$0xff] }
  0xfd   :  { %789 = vmatpush.msra.mxu2 %v1340_v17  ;;  %818 = vmatpush.msra.mxu3 %v746_v11  ;;  %v1380_v11 = vld [vmem:[%s2256_s3 + $0x148] sm:$0xff] }
  0xfe   :  { %v562_v25 = vpop.f32.mrf.mxu0 }
  0xff   :  { %v1817_v24 = vadd.f32 %v562_v25, %v492_v21  ;;  %v600_v27 = vpop.f32.mrf.mxu1  ;;  %894 = vmatpush.msrb.mxu3 %v1372_v42 }
 0x100   :  { %v616_v29 = vadd.f32 %v600_v27, %v495_v22 }
 0x102   :  { %647 = vrot.lane.b32.xlu1 %v616_v29, %s1427_s0  ;;  %641 = vrot.lane.b32.xlu2 %v1817_v24, %s1427_s0 }
 0x106   :  { %v565_v26 = vpop.f32.mrf.mxu0 }
 0x107   :  { %v1824_v34 = vadd.f32 %v565_v26, %v494_v13  ;;  %v603_v36 = vpop.f32.mrf.mxu1 }
 0x108   :  { %v618_v32 = vadd.f32 %v603_v36, %v497_v44  ;;  %v1370_v36 = vld [vmem:[%s2256_s3 + $0x108] sm:$0xff]  ;;  %v1369_v44 = vld [vmem:[%s2256_s3 + $0x100] sm:$0xff] }
 0x109   :  { %645 = vrot.lane.b32.xlu0 %v1824_v34, %s1427_s0 }
 0x10e   :  { %v568_v47 = vpop.f32.mrf.mxu0 }
 0x10f   :  { %v1833_v48 = vadd.f32 %v568_v47, %v496_v45  ;;  %v606_v50 = vpop.f32.mrf.mxu1  ;;  %v1361_v45 = vld [vmem:[%s2256_s3 + $0xd0] sm:$0xff]  ;;  %v1368_v47 = vld [vmem:[%s2256_s3 + $0xf8] sm:$0xff] }
 0x110   :  { %v620_v52 = vadd.f32 %v606_v50, %v499_v51  ;;  %851 = vmatpush.msrb.mxu2 %v1361_v45  ;;  %v1358_v50 = vld [vmem:[%s2256_s3 + $0xb8] sm:$0xff] }
 0x111   :  { %649 = vrot.lane.b32.xlu2 %v1833_v48, %s1427_s0  ;;  %651 = vrot.lane.b32.xlu0 %v618_v32, %s1427_s0  ;;  %v1367_v32 = vld [vmem:[%s2256_s3 + $0xf0] sm:$0xff] }
 0x112   :  { %852 = vmatpush.msrb.mxu2 %v1360_v15 }
 0x114   :  { %853 = vmatpush.msrb.mxu2 %v1359_v49 }
 0x116   :  { %v571_v38 = vpop.f32.mrf.mxu0  ;;  %854 = vmatpush.msrb.mxu2 %v1358_v50 }
 0x117   :  { %v1842_v53 = vadd.f32 %v571_v38, %v498_v18  ;;  %v1365_v18 = vld [vmem:[%s2256_s3 + $0xe0] sm:$0xff]  ;;  %v1357_v38 = vld [vmem:[%s2256_s3 + $0xb0] sm:$0xff] }
 0x118   :  { %855 = vmatpush.msrb.mxu2 %v1357_v38 }
 0x119   :  { %655 = vrot.lane.b32.xlu2 %v620_v52, %s1427_s0  ;;  %653 = vrot.lane.b32.xlu1 %v1842_v53, %s1427_s0 }
 0x11a   :  { %856 = vmatpush.msrb.mxu2 %v1356_v41 }
 0x11c   :  { %857 = vmatpush.msrb.mxu2 %v1355_v57 }
 0x11e   :  { %858 = vmatpush.msrb.mxu2 %v1354_v62 }
 0x120   :  { %859 = vmatpush.msrb.mxu2 %v1353_v0 }
 0x154   :  { %v644_v54 = vpop.permute.xlu2 %643 }
 0x15c   :  { %v636_v1 = vpop.permute.xlu0 %635  ;;  %v642_v3 = vpop.permute.xlu2 %641 }
 0x15d   :  { %v660_v5 = vsel %vm657_vm2, %v642_v3, %v644_v54  ;;  %v1382_v3 = vld [vmem:[%s2256_s3 + $0x158] sm:$0xff] }
 0x15e   :  { %v672_v6 = vmax.f32 %v1817_v24, %v660_v5 }
 0x160   :  { %v682_v14 = vadd.f32 %v1889_v2, %v672_v6 }
 0x162   :  { %v688_v20 = vmax.f32 %v682_v14, 0.0 }
 0x164   :  { %v730_v21 = vrot.slane %v688_v20, 1  ;;  %v640_v22 = vpop.permute.xlu1 %639  ;;  %v634_v23 = vpop.permute.xlu0 %633 }
 0x165   :  { %v658_v25 = vsel %vm657_vm2, %v634_v23, %v636_v1 }
 0x166   :  { %v734_v10 = vmax.f32 %v688_v20, %v730_v21  ;;  %v670_v24 = vmax.f32 %v1804_v59, %v658_v25  ;;  %v1379_v21 = vld [vmem:[%s2256_s3 + $0x140] sm:$0xff] }
 0x168   :  { %736 = vst.msk [vmem:[#allocation2 + $0x8] sm:$0x1] %vm700_vm3, %v734_v10  ;;  %v680_v27 = vadd.f32 %v1889_v2, %v670_v24  ;;  %v1375_v24 = vld [vmem:[%s2256_s3 + $0x120] sm:$0xff] }
 0x169   :  { %738 = vst.msk [vmem:[#allocation2 + $0x7] sm:$0x4] %vm703_vm4, %v734_v10 }
 0x16a   :  { %740 = vst.msk [vmem:[#allocation2 + $0x6] sm:$0x10] %vm706_vm5, %v734_v10  ;;  %v686_v29 = vmax.f32 %v680_v27, 0.0 }
 0x16b   :  { %742 = vst.msk [vmem:[#allocation2 + $0x5] sm:$0x40] %vm709_vm6, %v734_v10  ;;  %v1376_v10 = vld [vmem:[%s2256_s3 + $0x128] sm:$0xff] }
 0x16c   :  { %v694_v30 = vrot.slane %v686_v29, 1  ;;  %v638_v13 = vpop.permute.xlu1 %637 }
 0x16d   :  { %v659_v26 = vsel %vm657_vm2, %v638_v13, %v640_v22 }
 0x16e   :  { %v698_v33 = vmax.f32 %v686_v29, %v694_v30  ;;  %v671_v59 = vmax.f32 %v1810_v7, %v659_v26  ;;  %v1371_v7 = vld [vmem:[%s2256_s3 + $0x110] sm:$0xff] }
 0x16f   :  { %895 = vmatpush.msrb.mxu3 %v1371_v7 }
 0x170   :  { %701 = vst.msk [vmem:[#allocation2] sm:$0x1] %vm700_vm3, %v698_v33  ;;  %v681_v39 = vadd.f32 %v1889_v2, %v671_v59 }
 0x171   :  { %704 = vst.msk [vmem:[#allocation2 - $0x1] sm:$0x4] %vm703_vm4, %v698_v33  ;;  %896 = vmatpush.msrb.mxu3 %v1370_v36 }
 0x172   :  { %707 = vst.msk [vmem:[#allocation2 - $0x2] sm:$0x10] %vm706_vm5, %v698_v33  ;;  %v687_v12 = vmax.f32 %v681_v39, 0.0 }
 0x173   :  { %710 = vst.msk [vmem:[#allocation2 - $0x3] sm:$0x40] %vm709_vm6, %v698_v33  ;;  %897 = vmatpush.msrb.mxu3 %v1369_v44 }
 0x174   :  { %v714_v28 = vrot.slane %v687_v12, 1  ;;  %v648_v16 = vpop.permute.xlu1 %647 }
 0x175   :  { %898 = vmatpush.msrb.mxu3 %v1368_v47 }
 0x176   :  { %v718_v43 = vmax.f32 %v687_v12, %v714_v28 }
 0x177   :  { %899 = vmatpush.msrb.mxu3 %v1367_v32 }
 0x178   :  { %720 = vst.msk [vmem:[#allocation2 + $0x4] sm:$0x1] %vm700_vm3, %v718_v43 }
 0x179   :  { %722 = vst.msk [vmem:[#allocation2 + $0x3] sm:$0x4] %vm703_vm4, %v718_v43  ;;  %900 = vmatpush.msrb.mxu3 %v1366_v37 }
 0x17a   :  { %724 = vst.msk [vmem:[#allocation2 + $0x2] sm:$0x10] %vm706_vm5, %v718_v43 }
 0x17b   :  { %726 = vst.msk [vmem:[#allocation2 + $0x1] sm:$0x40] %vm709_vm6, %v718_v43  ;;  %v646_v31 = vpop.permute.xlu0 %645  ;;  %901 = vmatpush.msrb.mxu3 %v1365_v18  ;;  %v1397_v18 = vld [vmem:[%s2257_s4] ss:$0 sm:$0xff]  ;;  %s1229_s4 = sshll.u32 %s2264_s11, 4  ;;  %s1230_s4 = int_to_ptr.hbm [resolvable:$true] %s1229_s4 }
 0x17c   :  { %v661_v40 = vsel %vm657_vm2, %v646_v31, %v648_v16 }
 0x17d   :  { %v673_v51 = vmax.f32 %v1824_v34, %v661_v40  ;;  %v650_v34 = vpop.permute.xlu2 %649  ;;  %902 = vmatpush.msrb.mxu3 %v1364_v19 }
 0x17f   :  { %v683_v52 = vadd.f32 %v1889_v2, %v673_v51 }
 0x181   :  { %v689_v35 = vmax.f32 %v683_v52, 0.0 }
 0x182   :  { %v755_v46 = vld [vmem:[#allocation2 + $0x1] sm:$0xff] }
 0x183   :  { %v744_v54 = vld [vmem:[#allocation2] sm:$0xff]  ;;  %v695_v55 = vrot.slane %v689_v35, 1  ;;  %1349 = vmatmul.msk.f32.vlgmr.msra.gmra.mxu2 %vm767_vm7, %v755_v46  ;;  %v652_v56 = vpop.permute.xlu0 %651 }
 0x184   :  { %1351 = vmatmul.msk.f32.vlgmr.msra.gmra.mxu3 %vm767_vm7, %v744_v54  ;;  %v662_v58 = vsel %vm657_vm2, %v650_v34, %v652_v56  ;;  %v869_v30 = vld [vmem:[#allocation2 + $0x3] sm:$0xff] }
 0x185   :  { %v699_v60 = vmax.f32 %v689_v35, %v695_v55  ;;  %v674_v61 = vmax.f32 %v1833_v48, %v662_v58  ;;  %v1383_v48 = vld [vmem:[%s2256_s3 + $0x160] sm:$0xff]  ;;  %v656_v4 = vpop.permute.xlu2 %655  ;;  %v826_v13 = vld [vmem:[#allocation2 + $0x2] sm:$0xff] }
 0x186   :  { %937 = vmatpush.msra.mxu2 %v1383_v48  ;;  %v912_v59 = vld [vmem:[#allocation2 + $0x4] sm:$0xff] }
 0x187   :  { %702 = vst.msk [vmem:[#allocation2 + $0x10] sm:$0x1] %vm700_vm3, %v699_v60  ;;  %v684_v63 = vadd.f32 %v1889_v2, %v674_v61 }
 0x188   :  { %705 = vst.msk [vmem:[#allocation2 + $0xf] sm:$0x4] %vm703_vm4, %v699_v60  ;;  %938 = vmatpush.msra.mxu2 %v1382_v3 }
 0x189   :  { %708 = vst.msk [vmem:[#allocation2 + $0xe] sm:$0x10] %vm706_vm5, %v699_v60  ;;  %v690_v1 = vmax.f32 %v684_v63, 0.0 }
 0x18a   :  { %711 = vst.msk [vmem:[#allocation2 + $0xd] sm:$0x40] %vm709_vm6, %v699_v60  ;;  %939 = vmatpush.msra.mxu2 %v1381_v9 }
 0x18b   :  { %v715_v5 = vrot.slane %v690_v1, 1  ;;  %v654_v6 = vpop.permute.xlu1 %653 }
 0x18c   :  { %v663_v8 = vsel %vm657_vm2, %v654_v6, %v656_v4  ;;  %940 = vmatpush.msra.mxu2 %v1380_v11 }
 0x18d   :  { %v719_v14 = vmax.f32 %v690_v1, %v715_v5  ;;  %v675_v17 = vmax.f32 %v1842_v53, %v663_v8  ;;  %v1378_v53 = vld [vmem:[%s2256_s3 + $0x138] sm:$0xff] }
 0x18e   :  { %941 = vmatpush.msra.mxu2 %v1379_v21 }
 0x18f   :  { %721 = vst.msk [vmem:[#allocation2 + $0x14] sm:$0x1] %vm700_vm3, %v719_v14  ;;  %v685_v20 = vadd.f32 %v1889_v2, %v675_v17  ;;  %v1377_v2 = vld [vmem:[%s2256_s3 + $0x130] sm:$0xff]  ;;  %s1428_s3 = smov 64  }
 0x190   :  { %723 = vst.msk [vmem:[#allocation2 + $0x13] sm:$0x4] %vm703_vm4, %v719_v14  ;;  %942 = vmatpush.msra.mxu2 %v1378_v53 }
 0x191   :  { %725 = vst.msk [vmem:[#allocation2 + $0x12] sm:$0x10] %vm706_vm5, %v719_v14  ;;  %v691_v22 = vmax.f32 %v685_v20, 0.0 }
 0x192   :  { %727 = vst.msk [vmem:[#allocation2 + $0x11] sm:$0x40] %vm709_vm6, %v719_v14  ;;  %943 = vmatpush.msra.mxu2 %v1377_v2 }
 0x193   :  { %v731_v23 = vrot.slane %v691_v22, 1 }
 0x194   :  { %944 = vmatpush.msra.mxu2 %v1376_v10 }
 0x195   :  { %v735_v25 = vmax.f32 %v691_v22, %v731_v23 }
 0x196   :  { %945 = vmatpush.msra.mxu2 %v1375_v24 }
 0x197   :  { %737 = vst.msk [vmem:[#allocation2 + $0x18] sm:$0x1] %vm700_vm3, %v735_v25 }
 0x198   :  { %739 = vst.msk [vmem:[#allocation2 + $0x17] sm:$0x4] %vm703_vm4, %v735_v25 }
 0x199   :  { %741 = vst.msk [vmem:[#allocation2 + $0x16] sm:$0x10] %vm706_vm5, %v735_v25  ;;  %v745_v27 = vld [vmem:[#allocation2 + $0x10] sm:$0xff] }
 0x19a   :  { %743 = vst.msk [vmem:[#allocation2 + $0x15] sm:$0x40] %vm709_vm6, %v735_v25  ;;  %1352 = vmatmul.msk.f32.gmra.mxu3 %vm767_vm7, %v745_v27 }
 0x19e   :  { %v756_v29 = vld [vmem:[#allocation2 + $0x11] sm:$0xff] }
 0x19f   :  { %1350 = vmatmul.msk.f32.gmra.mxu2 %vm767_vm7, %v756_v29  ;;  %v827_v33 = vld [vmem:[#allocation2 + $0x12] sm:$0xff] }
 0x1a0   :  { %v870_v26 = vld [vmem:[#allocation2 + $0x13] sm:$0xff] }
 0x1a1   :  { %v913_v39 = vld [vmem:[#allocation2 + $0x14] sm:$0xff] }
 0x1a2   :  { %1373 = vmatmul.msk.f32.vlgmr.msrb.gmra.mxu3 %vm767_vm7, %v869_v30  ;;  %v1065_v29 = vld [vmem:[%s2258_s5 + $0x78] sm:$0xff] }
 0x1a3   :  { %v1081_v30 = vld [vmem:[%s2258_s5 + $0xf8] sm:$0xff]  ;;  %1092 = vmatpush.msra.mxu0 %v1065_v29 }
 0x1a4   :  { %1112 = vmatpush.msrb.mxu1 %v1081_v30 }
 0x1a7   :  { %1362 = vmatmul.msk.f32.vlgmr.msrb.gmra.mxu2 %vm767_vm7, %v826_v13  ;;  %v1064_v13 = vld [vmem:[%s2258_s5 + $0x70] sm:$0xff] }
 0x1a8   :  { %1093 = vmatpush.msra.mxu0 %v1064_v13  ;;  %v1179_v13 = vld [vmem:[%s2262_s9 + $0x10] sm:$0xff] }
 0x1aa   :  { %1374 = vmatmul.msk.f32.gmra.mxu3 %vm767_vm7, %v870_v26  ;;  %v1080_v26 = vld [vmem:[%s2258_s5 + $0xf0] sm:$0xff] }
 0x1ab   :  { %1113 = vmatpush.msrb.mxu1 %v1080_v26  ;;  %v1178_v26 = vld [vmem:[%s2262_s9 + $0x8] sm:$0xff] }
 0x1af   :  { %1363 = vmatmul.msk.f32.gmra.mxu2 %vm767_vm7, %v827_v33  ;;  %v1063_v33 = vld [vmem:[%s2258_s5 + $0x68] sm:$0xff] }
 0x1b0   :  { %1094 = vmatpush.msra.mxu0 %v1063_v33  ;;  %v1177_v33 = vld [vmem:[%s2262_s9] sm:$0xff] }
 0x1b7   :  { %1384 = vmatmul.msk.f32.vlgmr.msra.gmra.mxu2 %vm767_vm7, %v912_v59  ;;  %v1079_v59 = vld [vmem:[%s2258_s5 + $0xe8] sm:$0xff] }
 0x1b8   :  { %1114 = vmatpush.msrb.mxu1 %v1079_v59  ;;  %v1399_v59 = vld [vmem:[%s2261_s8] ss:$0 sm:$0xff] }
 0x1bf   :  { %1385 = vmatmul.msk.f32.gmra.mxu2 %vm767_vm7, %v913_v39  ;;  %v1062_v39 = vld [vmem:[%s2258_s5 + $0x60] sm:$0xff] }
 0x1c0   :  { %1095 = vmatpush.msra.mxu0 %v1062_v39 }
 0x206   :  { %v791_v42 = vpop.f32.mrf.mxu2 }
 0x207   :  { %v820_v7 = vpop.f32.mrf.mxu3 }
 0x208   :  { %v821_v44 = vadd.f32 %v820_v7, %v791_v42  ;;  %v1078_v42 = vld [vmem:[%s2258_s5 + $0xe0] sm:$0xff]  ;;  %v1077_v7 = vld [vmem:[%s2258_s5 + $0xd8] sm:$0xff] }
 0x209   :  { %1115 = vmatpush.msrb.mxu1 %v1078_v42 }
 0x20b   :  { %1116 = vmatpush.msrb.mxu1 %v1077_v7  ;;  %v1400_v7 = vld [vmem:[%s2263_s10] ss:$0 sm:$0xff] }
 0x21d   :  { %v823_v36 = vpop.f32.mrf.mxu3 }
 0x222   :  { %v794_v12 = vpop.f32.mrf.mxu2 }
 0x223   :  { %v824_v49 = vadd.f32 %v823_v36, %v794_v12  ;;  %v1061_v12 = vld [vmem:[%s2258_s5 + $0x58] sm:$0xff]  ;;  %v1076_v36 = vld [vmem:[%s2258_s5 + $0xd0] sm:$0xff] }
 0x224   :  { %1096 = vmatpush.msra.mxu0 %v1061_v12  ;;  %1117 = vmatpush.msrb.mxu1 %v1076_v36 }
 0x225   :  { %v904_v47 = vpop.f32.mrf.mxu3 }
 0x22a   :  { %v861_v28 = vpop.f32.mrf.mxu2 }
 0x22b   :  { %v867_v45 = vadd.f32 %v861_v28, %v821_v44  ;;  %v1060_v28 = vld [vmem:[%s2258_s5 + $0x50] sm:$0xff]  ;;  %v1075_v44 = vld [vmem:[%s2258_s5 + $0xc8] sm:$0xff] }
 0x22c   :  { %1097 = vmatpush.msra.mxu0 %v1060_v28  ;;  %1118 = vmatpush.msrb.mxu1 %v1075_v44 }
 0x22d   :  { %v910_v15 = vadd.f32 %v904_v47, %v867_v45  ;;  %v907_v37 = vpop.f32.mrf.mxu3  ;;  %v1058_v45 = vld [vmem:[%s2258_s5 + $0x40] sm:$0xff] }
 0x22e   :  { %v1074_v47 = vld [vmem:[%s2258_s5 + $0xc0] sm:$0xff] }
 0x22f   :  { %1119 = vmatpush.msrb.mxu1 %v1074_v47 }
 0x232   :  { %v864_v43 = vpop.f32.mrf.mxu2 }
 0x233   :  { %v868_v31 = vadd.f32 %v864_v43, %v824_v49  ;;  %v1059_v43 = vld [vmem:[%s2258_s5 + $0x48] sm:$0xff]  ;;  %v1056_v49 = vld [vmem:[%s2258_s5 + $0x30] sm:$0xff] }
 0x234   :  { %1098 = vmatpush.msra.mxu0 %v1059_v43 }
 0x235   :  { %v911_v40 = vadd.f32 %v907_v37, %v868_v31  ;;  %v1055_v31 = vld [vmem:[%s2258_s5 + $0x28] sm:$0xff] }
 0x236   :  { %1099 = vmatpush.msra.mxu0 %v1058_v45 }
 0x23a   :  { %v947_v32 = vpop.f32.mrf.mxu2 }
 0x23b   :  { %v953_v16 = vadd.f32 %v947_v32, %v910_v15  ;;  %v1057_v15 = vld [vmem:[%s2258_s5 + $0x38] sm:$0xff] }
 0x23c   :  { %v1073_v32 = vld [vmem:[%s2258_s5 + $0xb8] sm:$0xff]  ;;  %1100 = vmatpush.msra.mxu0 %v1057_v15 }
 0x23d   :  { %957 = vrot.lane.b32.xlu1 %v953_v16, %s1428_s3  ;;  %1120 = vmatpush.msrb.mxu1 %v1073_v32 }
 0x23e   :  { %1101 = vmatpush.msra.mxu0 %v1056_v49 }
 0x240   :  { %1102 = vmatpush.msra.mxu0 %v1055_v31 }
 0x242   :  { %v950_v50 = vpop.f32.mrf.mxu2 }
 0x243   :  { %v954_v51 = vadd.f32 %v950_v50, %v911_v40  ;;  %v1071_v40 = vld [vmem:[%s2258_s5 + $0xa8] sm:$0xff]  ;;  %v1054_v50 = vld [vmem:[%s2258_s5 + $0x20] sm:$0xff] }
 0x244   :  { %1103 = vmatpush.msra.mxu0 %v1054_v50 }
 0x245   :  { %959 = vrot.lane.b32.xlu0 %v954_v51, %s1428_s3 }
 0x2af   :  { %v958_v38 = vpop.permute.xlu1 %957 }
 0x2b0   :  { %v963_v52 = vmax.f32 %v953_v16, %v958_v38  ;;  %v1072_v16 = vld [vmem:[%s2258_s5 + $0xb0] sm:$0xff]  ;;  %v1069_v38 = vld [vmem:[%s2258_s5 + $0x98] sm:$0xff] }
 0x2b1   :  { %1121 = vmatpush.msrb.mxu1 %v1072_v16 }
 0x2b2   :  { %v969_v19 = vadd.f32 %v1397_v18, %v963_v52  ;;  %v1052_v52 = vld [vmem:[%s2258_s5 + $0x10] sm:$0xff] }
 0x2b3   :  { %1122 = vmatpush.msrb.mxu1 %v1071_v40 }
 0x2b4   :  { %v971_v34 = vmax.f32 %v969_v19, 0.0  ;;  %v1068_v19 = vld [vmem:[%s2258_s5 + $0x90] sm:$0xff] }
 0x2b6   :  { %v975_v35 = vrot.slane %v971_v34, 1 }
 0x2b7   :  { %v960_v41 = vpop.permute.xlu0 %959 }
 0x2b8   :  { %v979_v46 = vmax.f32 %v971_v34, %v975_v35  ;;  %v964_v54 = vmax.f32 %v954_v51, %v960_v41  ;;  %v1070_v51 = vld [vmem:[%s2258_s5 + $0xa0] sm:$0xff]  ;;  %v1051_v34 = vld [vmem:[%s2258_s5 + $0x8] sm:$0xff] }
 0x2b9   :  { %1123 = vmatpush.msrb.mxu1 %v1070_v51  ;;  %v1067_v35 = vld [vmem:[%s2258_s5 + $0x88] sm:$0xff]  ;;  %v1050_v41 = vld [vmem:[%s2258_s5] sm:$0xff] }
 0x2ba   :  { %999 = vst.sshfl [vmem:[#allocation1] sm:$0xff pattern:$0x73625140] %v979_v46  ;;  %v970_v55 = vadd.f32 %v1397_v18, %v964_v54  ;;  %v1053_v18 = vld [vmem:[%s2258_s5 + $0x18] sm:$0xff]  ;;  %v1147_v54 = vld [vmem:[%s2260_s7 + $0x70] sm:$0xff] }
 0x2bb   :  { %1104 = vmatpush.msra.mxu0 %v1053_v18  ;;  %1124 = vmatpush.msrb.mxu1 %v1069_v38 }
 0x2bc   :  { %v972_v56 = vmax.f32 %v970_v55, 0.0  ;;  %v1146_v55 = vld [vmem:[%s2260_s7 + $0x68] sm:$0xff]  ;;  %1157 = vmatpush.msra.mxu3 %v1147_v54 }
 0x2bd   :  { %1105 = vmatpush.msra.mxu0 %v1052_v52  ;;  %1125 = vmatpush.msrb.mxu1 %v1068_v19 }
 0x2be   :  { %v976_v57 = vrot.slane %v972_v56, 1  ;;  %1158 = vmatpush.msra.mxu3 %v1146_v55 }
 0x2bf   :  { %1106 = vmatpush.msra.mxu0 %v1051_v34  ;;  %1126 = vmatpush.msrb.mxu1 %v1067_v35 }
 0x2c0   :  { %v980_v58 = vmax.f32 %v972_v56, %v976_v57  ;;  %v1145_v56 = vld [vmem:[%s2260_s7 + $0x60] sm:$0xff]  ;;  %v1144_v57 = vld [vmem:[%s2260_s7 + $0x58] sm:$0xff] }
 0x2c1   :  { %v1001_v60 = vld [vmem:[#allocation1 + $0x1] ss:$4 sm:$0xff]  ;;  %1107 = vmatpush.msra.mxu0 %v1050_v41  ;;  %1159 = vmatpush.msra.mxu3 %v1145_v56 }
 0x2c2   :  { %1002 = vst.sshfl [vmem:[#allocation1 + $0x20] sm:$0xff pattern:$0x73625140] %v980_v58  ;;  %v987_v61 = vrot.slane %v980_v58, 7 }
 0x2c3   :  { %1017 = vst.sshfl [vmem:[#allocation1] sm:$0xff pattern:$0x73625140] %v979_v46  ;;  %1160 = vmatpush.msra.mxu3 %v1144_v57 }
 0x2c4   :  { %v989_v62 = vsel %vm988_vm8, %v987_v61, %v979_v46 }
 0x2c5   :  { %v991_v63 = vsel %vm990_vm9, %v987_v61, %v989_v62  ;;  %v1140_v62 = vld [vmem:[%s2260_s7 + $0x38] sm:$0xff] }
 0x2c6   :  { %v993_v0 = vsel %vm992_vm10, %v987_v61, %v991_v63 }
 0x2c7   :  { %v995_v48 = vsel %vm994_vm11, %v987_v61, %v993_v0  ;;  %v1141_v61 = vld [vmem:[%s2260_s7 + $0x40] sm:$0xff]  ;;  %v1139_v0 = vld [vmem:[%s2260_s7 + $0x30] sm:$0xff] }
 0x2c8   :  { %998 = vst.msk [vmem:[#allocation3] sm:$0x3] %vm997_vm12, %v995_v48  ;;  %v1138_v48 = vld [vmem:[%s2260_s7 + $0x28] sm:$0xff] }
 0x2c9   :  { %v1004_v1 = vld [vmem:[#allocation1 + $0x21] ss:$4 sm:$0xff] }
 0x2ca   :  { %v1007_v3 = vrot.slane %v1004_v1, 7  ;;  %v1019_v4 = vld [vmem:[#allocation1 + $0x2] ss:$4 sm:$0xff]  ;;  %1020 = vst.sshfl [vmem:[#allocation1 + $0x20] sm:$0xff pattern:$0x73625140] %v980_v58 }
 0x2cb   :  { %1032 = vst.sshfl [vmem:[#allocation1] sm:$0xff pattern:$0x73625140] %v979_v46  ;;  %v1066_v46 = vld [vmem:[%s2258_s5 + $0x80] sm:$0xff] }
 0x2cc   :  { %v1008_v5 = vsel %vm988_vm8, %v1007_v3, %v1001_v60  ;;  %1127 = vmatpush.msrb.mxu1 %v1066_v46  ;;  %v1142_v60 = vld [vmem:[%s2260_s7 + $0x48] sm:$0xff]  ;;  %v1137_v1 = vld [vmem:[%s2260_s7 + $0x20] sm:$0xff] }
 0x2cd   :  { %v1009_v6 = vsel %vm990_vm9, %v1007_v3, %v1008_v5 }
 0x2ce   :  { %v1010_v8 = vsel %vm992_vm10, %v1007_v3, %v1009_v6  ;;  %v1136_v6 = vld [vmem:[%s2260_s7 + $0x18] sm:$0xff] }
 0x2cf   :  { %v1011_v9 = vsel %vm994_vm11, %v1007_v3, %v1010_v8  ;;  %v1135_v8 = vld [vmem:[%s2260_s7 + $0x10] sm:$0xff] }
 0x2d0   :  { %1012 = vrot.lane.b32.xlu2 %v1011_v9, %s1428_s3  ;;  %v1134_v9 = vld [vmem:[%s2260_s7 + $0x8] sm:$0xff] }
 0x2d1   :  { %v1022_v14 = vld [vmem:[#allocation1 + $0x22] ss:$4 sm:$0xff] }
 0x2d2   :  { %1035 = vst.sshfl [vmem:[#allocation1 + $0x20] sm:$0xff pattern:$0x73625140] %v980_v58  ;;  %v1025_v17 = vrot.slane %v1022_v14, 7  ;;  %v1034_v2 = vld [vmem:[#allocation1 + $0x3] ss:$4 sm:$0xff] }
 0x2d3   :  { %v1143_v58 = vld [vmem:[%s2260_s7 + $0x50] sm:$0xff] }
 0x2d4   :  { %v1026_v11 = vsel %vm988_vm8, %v1025_v17, %v1019_v4  ;;  %1161 = vmatpush.msra.mxu3 %v1143_v58  ;;  %v1187_v14 = vld [vmem:[%s2262_s9 + $0x50] sm:$0xf] }
 0x2d5   :  { %v1027_v20 = vsel %vm990_vm9, %v1025_v17, %v1026_v11  ;;  %1387 = vmatpush.msk.msrb.mxu2 %vm87_vm0, %v1187_v14  ;;  %v1133_v11 = vld [vmem:[%s2260_s7] sm:$0xff]  ;;  %vm1220_vm0 = vcmask 74752  }
 0x2d6   :  { %v1028_v21 = vsel %vm992_vm10, %v1025_v17, %v1027_v20  ;;  %1162 = vmatpush.msra.mxu3 %v1142_v60  ;;  %v1185_v20 = vld [vmem:[%s2262_s9 + $0x40] sm:$0xff] }
 0x2d7   :  { %v1029_v22 = vsel %vm994_vm11, %v1025_v17, %v1028_v21  ;;  %v1186_v17 = vld [vmem:[%s2262_s9 + $0x48] sm:$0xff]  ;;  %v1184_v21 = vld [vmem:[%s2262_s9 + $0x38] sm:$0xff] }
 0x2d8   :  { %1031 = vst.msk [vmem:[#allocation3 + $0x2] sm:$0x3] %vm997_vm12, %v1029_v22  ;;  %1163 = vmatpush.msra.mxu3 %v1141_v61  ;;  %1205 = vmatpush.msrb.mxu2 %v1186_v17  ;;  %v1183_v22 = vld [vmem:[%s2262_s9 + $0x30] sm:$0xff] }
 0x2d9   :  { %v1037_v53 = vld [vmem:[#allocation1 + $0x23] ss:$4 sm:$0xff] }
 0x2da   :  { %v1040_v23 = vrot.slane %v1037_v53, 7  ;;  %1164 = vmatpush.msra.mxu3 %v1140_v62  ;;  %1206 = vmatpush.msrb.mxu2 %v1185_v20  ;;  %v1182_v53 = vld [vmem:[%s2262_s9 + $0x28] sm:$0xff] }
 0x2dc   :  { %v1041_v25 = vsel %vm988_vm8, %v1040_v23, %v1034_v2  ;;  %1165 = vmatpush.msra.mxu3 %v1139_v0  ;;  %1207 = vmatpush.msrb.mxu2 %v1184_v21  ;;  %v1180_v2 = vld [vmem:[%s2262_s9 + $0x18] sm:$0xff] }
 0x2dd   :  { %v1042_v10 = vsel %vm990_vm9, %v1040_v23, %v1041_v25  ;;  %v1398_v25 = vld [vmem:[%s2259_s6] ss:$0 sm:$0xff] }
 0x2de   :  { %v1043_v24 = vsel %vm992_vm10, %v1040_v23, %v1042_v10  ;;  %1166 = vmatpush.msra.mxu3 %v1138_v48  ;;  %1208 = vmatpush.msrb.mxu2 %v1183_v22 }
 0x2df   :  { %v1044_v27 = vsel %vm994_vm11, %v1040_v23, %v1043_v24  ;;  %v1181_v23 = vld [vmem:[%s2262_s9 + $0x20] sm:$0xff] }
 0x2e0   :  { %1045 = vrot.lane.b32.xlu0 %v1044_v27, %s1428_s3  ;;  %1167 = vmatpush.msra.mxu3 %v1137_v1 }
 0x2e1   :  { %1209 = vmatpush.msrb.mxu2 %v1182_v53 }
 0x2e2   :  { %1168 = vmatpush.msra.mxu3 %v1136_v6 }
 0x2e3   :  { %1210 = vmatpush.msrb.mxu2 %v1181_v23 }
 0x2e4   :  { %1169 = vmatpush.msra.mxu3 %v1135_v8 }
 0x2e5   :  { %1211 = vmatpush.msrb.mxu2 %v1180_v2 }
 0x2e6   :  { %1170 = vmatpush.msra.mxu3 %v1134_v9 }
 0x2e7   :  { %1212 = vmatpush.msrb.mxu2 %v1179_v13 }
 0x2e8   :  { %1171 = vmatpush.msra.mxu3 %v1133_v11 }
 0x2e9   :  { %1213 = vmatpush.msrb.mxu2 %v1178_v26 }
 0x2eb   :  { %1214 = vmatpush.msrb.mxu2 %v1177_v33 }
 0x32a   :  { %v1013_v37 = vpop.permute.xlu2 %1012 }
 0x32b   :  { %1016 = vst.msk [vmem:[#allocation3] sm:$0x3] %vm1015_vm13, %v1013_v37 }
 0x352   :  { %v1046_v63 = vpop.permute.xlu0 %1045 }
 0x353   :  { %1048 = vst.msk [vmem:[#allocation3 + $0x2] sm:$0x3] %vm1015_vm13, %v1046_v63 }
 0x35a   :  { %v1049_v3 = vld [vmem:[#allocation3] sm:$0xf] }
 0x35b   :  { %1087 = vst [vmem:[#allocation1] ss:$4 sm:$0xff] %v1049_v3 }
 0x362   :  { %v1088_v4 = vld.sshfl [vmem:[#allocation1] sm:$0xff pattern:$0x73625140]  ;;  %v1089_v5 = vld.sshfl [vmem:[#allocation1 + $0x8] sm:$0xff pattern:$0x73625140] }
 0x363   :  { %1108 = vmatmul.f32.vlgmr.msra.gmra.mxu0 %v1088_v4  ;;  %1128 = vmatmul.f32.vlgmr.msrb.gmra.mxu1 %v1089_v5 }
 0x3e0   :  { %v1109_v10 = vpop.f32.mrf.mxu0  ;;  %v1129_v27 = vpop.f32.mrf.mxu1 }
 0x3e1   :  { %v1110_v24 = vadd.f32 %v1398_v25, %v1109_v10 }
 0x3e3   :  { %v1130_v29 = vadd.f32 %v1129_v27, %v1110_v24 }
 0x3e5   :  { %v1132_v30 = vmax.f32 %v1130_v29, 0.0 }
 0x3e7   :  { %1386 = vmatmul.msk.f32.vlgmr.msra.gmra.mxu3 %vm1152_vm14, %v1132_v30 }
 0x46a   :  { %v1173_v39 = vpop.f32.mrf.mxu3 }
 0x46b   :  { %v1174_v42 = vadd.f32 %v1399_v59, %v1173_v39 }
 0x46d   :  { %v1176_v12 = vmax.f32 %v1174_v42, 0.0 }
 0x46f   :  { %1388 = vmatmul.msk.f32.vlgmr.msrb.gmra.mxu2 %vm1192_vm15, %v1176_v12 }
 0x4f2   :  { %v1216_v28 = vpop.f32.mrf.mxu2 }
 0x4f3   :  { %v1217_v36 = vadd.f32 %v1400_v7, %v1216_v28 }
 0x4f5   :  { %v1219_v43 = vmax.f32 %v1217_v36, 0.0 }
 0x4f7   :  { %1221 = vst.msk [vmem:[#allocation4] sm:$0x3] %vm1220_vm0, %v1219_v43 }
 0x4f8   :  { %1232 = dma.vmem_to_hbm [thread:$0]  %s1228_s28, 32, %s1230_s4, [#allocation5]  }
 0x4f9   :  { %1425 = dma.done.wait [#allocation5], 32  }
 0x4fa   :  { %1426 = vsyncadd [#allocation5], 4294967264 }
 0x4fb   :  { %1237 = vsyncpa [#allocation5], 1 }

</bundles_post_ra>
